<compile_context>
chip_gen: v6e
topology: v6e:2x2x1
jax: 0.10.0
libtpu: 0.0.40
codegen_flags: <defaults>
</compile_context>

<pallas_src>
import functools

import jax
import jax.numpy as jnp
from jax import lax
from jax.experimental import pallas as pl
from jax.experimental.pallas import tpu as pltpu


# ---------------------------------------------------------------------------
# Fused Pallas kernel: conv1 (im2col matmul) + BN(eval) + ReLU + 3x3/s2 maxpool
# ---------------------------------------------------------------------------

def _stem_fused_kernel(p00_ref, p01_ref, p10_ref, p11_ref,
                       w_ref, scale_ref, shift_ref, o_ref, buf_ref, *, w2):
    """One image per grid step.

    p??_ref  : (1, K, N2p) bf16 im2col patches for conv-output parity (row,col);
               flat column n = rh*W2 + wc is conv output (2*rh+row_par, 2*wc+col_par)
    w_ref    : (Co, K)  bf16  conv1 weight
    scale_ref: (Co, 1)  f32   BN scale  (gamma / sqrt(var+eps)), applied in f32
    shift_ref: (Co, 1)  f32   BN shift  (beta - mean*scale)
    o_ref    : (1, Co, N2p) f32  pooled output, flattened (H2, W2), lane-dense
    buf_ref  : (Co, N2p + w2) f32  VMEM scratch used to lane-shift values
    """
    co = o_ref.shape[1]
    n2p = o_ref.shape[2]

    w = w_ref[...]
    scale = scale_ref[...]
    shift = shift_ref[...]

    def conv(p_ref):
        acc = jnp.dot(w, p_ref[0], preferred_element_type=jnp.float32)  # MXU
        return jnp.maximum(acc * scale + shift, 0.0)                    # BN + ReLU

    # Conv output at the four (row, col) parities of the conv-output grid.
    y00 = conv(p00_ref)   # even rows, even cols
    y01 = conv(p01_ref)   # even rows, odd  cols
    y10 = conv(p10_ref)   # odd  rows, even cols
    y11 = conv(p11_ref)   # odd  rows, odd  cols

    def shifted_right(val, k):
        # val shifted right by k lanes (fill -inf), via the VMEM scratch.
        buf_ref[:, pl.ds(0, k)] = jnp.full((co, k), -jnp.inf, jnp.float32)
        buf_ref[:, pl.ds(k, n2p)] = val
        return buf_ref[:, pl.ds(0, n2p)]

    # Column stage: pooled col wo2 uses conv cols {2wo2-1, 2wo2, 2wo2+1}
    #             = {odd[wo2-1], even[wo2], odd[wo2]}.
    lane = lax.broadcasted_iota(jnp.int32, (co, n2p), 1)
    row_start = (lane % w2) == 0          # wo2 == 0 -> left neighbour is the pad

    def colmax(y_even, y_odd):
        left = shifted_right(y_odd, 1)
        left = jnp.where(row_start, -jnp.inf, left)
        return jnp.maximum(jnp.maximum(left, y_even), y_odd)

    cm0 = colmax(y00, y01)                # column max over even conv rows
    cm1 = colmax(y10, y11)                # column max over odd  conv rows

    # Row stage: pooled row ho2 uses conv rows {2ho2-1, 2ho2, 2ho2+1}
    #          = {odd row of pair ho2-1, even row of pair ho2, odd row of pair ho2}.
    up = shifted_right(cm1, w2)           # shift by one pooled row; fill -inf
    o_ref[0] = jnp.maximum(jnp.maximum(up, cm0), cm1)


# ---------------------------------------------------------------------------
# Wrapper: layout glue (bf16 parity im2col) + the single pallas_call
# ---------------------------------------------------------------------------

def thermal_moduleA_forward(x, params):
    """conv1(7x7, s2, p3, no bias) -> BatchNorm(eval) -> ReLU -> maxpool(3x3, s2, p1)."""
    B, Ci, H, W = x.shape
    # TODO(synk): general H/W need an extra -inf edge band in the pool; the
    # ResNet stem is used with H, W multiples of 4 (e.g. 224), so require that.
    assert H % 4 == 0 and W % 4 == 0, "H and W must be multiples of 4"
    Co = params["conv_w"].shape[0]
    K = Ci * 7 * 7
    H2, W2 = H // 4, W // 4                       # pooled output size
    N2 = H2 * W2
    N2p = ((N2 + 127) // 128) * 128               # lane-dense output width

    # --- wrapper glue (pure layout): bf16 BEFORE the patch gather ----------
    xb = x.astype(jnp.bfloat16)
    xp = jnp.pad(xb, ((0, 0), (0, 0), (3, 3), (3, 3)))   # conv zero padding

    def parity_patches(pr, pc):
        # im2col restricted to conv outputs (2*rh+pr, 2*wc+pc): input stride 4.
        cols = []
        for i in range(7):
            for j in range(7):
                r0, c0 = 2 * pr + i, 2 * pc + j
                cols.append(lax.slice(
                    xp, (0, 0, r0, c0),
                    (B, Ci, r0 + 4 * (H2 - 1) + 1, c0 + 4 * (W2 - 1) + 1),
                    (1, 1, 4, 4)))
        # patch index = ci*49 + i*7 + j  (matches conv_w.reshape(Co, K))
        pat = jnp.stack(cols, axis=2).reshape(B, K, N2)
        if N2p != N2:
            pat = jnp.pad(pat, ((0, 0), (0, 0), (0, N2p - N2)))
        return pat

    p00 = parity_patches(0, 0)
    p01 = parity_patches(0, 1)
    p10 = parity_patches(1, 0)
    p11 = parity_patches(1, 1)

    # Eval-mode BatchNorm folded to per-channel scale/shift, applied in f32 in
    # the kernel epilogue (the conv weight itself stays plain bf16).
    eps = 1e-5
    scale = params["bn_gamma"] / jnp.sqrt(params["bn_var"] + eps)
    shift = params["bn_beta"] - params["bn_mean"] * scale
    w_mat = params["conv_w"].reshape(Co, K).astype(jnp.bfloat16)
    scale = scale.reshape(Co, 1).astype(jnp.float32)
    shift = shift.reshape(Co, 1).astype(jnp.float32)

    kernel = functools.partial(_stem_fused_kernel, w2=W2)
    patch_spec = pl.BlockSpec((1, K, N2p), lambda b: (b, 0, 0))

    out = pl.pallas_call(
        kernel,
        out_shape=jax.ShapeDtypeStruct((B, Co, N2p), jnp.float32),
        grid_spec=pltpu.PrefetchScalarGridSpec(
            num_scalar_prefetch=0,
            grid=(B,),                      # per-image; B>=2 -> both v7x cores busy
            in_specs=[
                patch_spec, patch_spec, patch_spec, patch_spec,
                pl.BlockSpec((Co, K), lambda b: (0, 0)),
                pl.BlockSpec((Co, 1), lambda b: (0, 0)),
                pl.BlockSpec((Co, 1), lambda b: (0, 0)),
            ],
            out_specs=pl.BlockSpec((1, Co, N2p), lambda b: (b, 0, 0)),
            scratch_shapes=[pltpu.VMEM((Co, N2p + W2), jnp.float32)],
        ),
        compiler_params=pltpu.CompilerParams(
            dimension_semantics=("parallel",),
            vmem_limit_bytes=48 * 1024 * 1024,   # v7x-safe; ample for v5e/v6e
        ),
    )(p00, p01, p10, p11, w_mat, scale, shift)

    return out[:, :, :N2].reshape(B, Co, H2, W2)


# ---------------------------------------------------------------------------
# Pure-JAX f32 reference mirroring the PyTorch forward exactly
# ---------------------------------------------------------------------------

def thermal_moduleA_reference(x, params):
    y = lax.conv_general_dilated(
        x, params["conv_w"], window_strides=(2, 2),
        padding=((3, 3), (3, 3)),
        dimension_numbers=("NCHW", "OIHW", "NCHW"))
    eps = 1e-5
    scale = params["bn_gamma"] / jnp.sqrt(params["bn_var"] + eps)
    shift = params["bn_beta"] - params["bn_mean"] * scale
    y = y * scale[None, :, None, None] + shift[None, :, None, None]
    y = jnp.maximum(y, 0.0)
    y = lax.reduce_window(
        y, -jnp.inf, lax.max,
        window_dimensions=(1, 1, 3, 3), window_strides=(1, 1, 2, 2),
        padding=((0, 0), (0, 0), (1, 1), (1, 1)))
    return y


def init_params(key):
    """Deterministic stand-in for the pretrained ResNet-50 stem parameters."""
    k1, k2, k3, k4, k5 = jax.random.split(key, 5)
    fan_in = 3 * 7 * 7
    bound = 1.0 / float(jnp.sqrt(fan_in))
    return {
        "conv_w": jax.random.uniform(k1, (64, 3, 7, 7), jnp.float32, -bound, bound),
        # Nonzero BN parameters / running stats so the BN path is exercised.
        "bn_gamma": jax.random.uniform(k2, (64,), jnp.float32, 0.5, 1.5),
        "bn_beta": 0.1 * jax.random.normal(k3, (64,), jnp.float32),
        "bn_mean": 0.1 * jax.random.normal(k4, (64,), jnp.float32),
        "bn_var": jax.random.uniform(k5, (64,), jnp.float32, 0.5, 1.5),
    }


if __name__ == "__main__":
    B, Ci, H, W = 2, 3, 64, 64
    key = jax.random.PRNGKey(0)
    kx, kp = jax.random.split(key)
    x = jax.random.normal(kx, (B, Ci, H, W), jnp.float32)
    params = init_params(kp)

    fwd = jax.jit(thermal_moduleA_forward)
    ref = jax.jit(thermal_moduleA_reference)

    z = jax.block_until_ready(fwd(x, params))
    z_ref = jax.block_until_ready(ref(x, params))

    assert z.shape == z_ref.shape == (B, 64, 16, 16), (z.shape, z_ref.shape)
    err = float(jnp.max(jnp.abs(z - z_ref)))
    # bf16 MXU operands with f32 accumulation -> small quantization error vs f32 ref.
    assert jnp.allclose(z, z_ref, atol=2e-2, rtol=2e-2), err
    print("KERNEL_OK")
</pallas_src>

<mosaic_0001>
module attributes {stable_mosaic.version = 11 : i64} {
  func.func @_stem_fused_kernel(%arg0: i32, %arg1: memref<1x147x256xbf16, #tpu.memory_space<vmem>>, %arg2: memref<1x147x256xbf16, #tpu.memory_space<vmem>>, %arg3: memref<1x147x256xbf16, #tpu.memory_space<vmem>>, %arg4: memref<1x147x256xbf16, #tpu.memory_space<vmem>>, %arg5: memref<64x147xbf16, #tpu.memory_space<vmem>>, %arg6: memref<64x1xf32, #tpu.memory_space<vmem>>, %arg7: memref<64x1xf32, #tpu.memory_space<vmem>>, %arg8: memref<1x64x256xf32, #tpu.memory_space<vmem>>, %arg9: memref<64x272xf32, #tpu.memory_space<vmem>>) attributes {dimension_semantics = [#tpu.dimension_semantics<parallel>], iteration_bounds = array<i64: 2>, scalar_prefetch = 0 : i64, scratch_operands = 1 : i64, tpu.core_type = #tpu.core_type<tc>, window_params = [{transform_indices = @transform_0, window_bounds = array<i64: 1, 147, 256>}, {transform_indices = @transform_1, window_bounds = array<i64: 1, 147, 256>}, {transform_indices = @transform_2, window_bounds = array<i64: 1, 147, 256>}, {transform_indices = @transform_3, window_bounds = array<i64: 1, 147, 256>}, {pipeline_mode = #tpu.pipeline_mode<synchronous>, transform_indices = @transform_4, window_bounds = array<i64: 64, 147>}, {pipeline_mode = #tpu.pipeline_mode<synchronous>, transform_indices = @transform_5, window_bounds = array<i64: 64, 1>}, {pipeline_mode = #tpu.pipeline_mode<synchronous>, transform_indices = @transform_6, window_bounds = array<i64: 64, 1>}, {transform_indices = @transform_7, window_bounds = array<i64: 1, 64, 256>}]} {
    %c0 = arith.constant 0 : index
    %c0_0 = arith.constant 0 : index
    %0 = vector.load %arg5[%c0, %c0_0] : memref<64x147xbf16, #tpu.memory_space<vmem>>, vector<64x147xbf16>
    %c0_1 = arith.constant 0 : index
    %c0_2 = arith.constant 0 : index
    %1 = vector.load %arg6[%c0_1, %c0_2] : memref<64x1xf32, #tpu.memory_space<vmem>>, vector<64x1xf32>
    %c0_3 = arith.constant 0 : index
    %c0_4 = arith.constant 0 : index
    %2 = vector.load %arg7[%c0_3, %c0_4] : memref<64x1xf32, #tpu.memory_space<vmem>>, vector<64x1xf32>
    %c0_5 = arith.constant 0 : index
    %c0_6 = arith.constant 0 : index
    %c0_7 = arith.constant 0 : index
    %3 = vector.load %arg1[%c0_5, %c0_6, %c0_7] : memref<1x147x256xbf16, #tpu.memory_space<vmem>>, vector<1x147x256xbf16>
    %4 = vector.shape_cast %3 : vector<1x147x256xbf16> to vector<147x256xbf16>
    %cst = arith.constant dense<0.000000e+00> : vector<64x256xf32>
    %5 = tpu.matmul %0, %4, %cst {dimension_numbers = #tpu.dot_dimension_numbers<[1], [0], [0], [1], [0, 0, 1, 1], [], []>} : vector<64x147xbf16>, vector<147x256xbf16>, vector<64x256xf32> -> vector<64x256xf32>
    %6 = vector.broadcast %1 : vector<64x1xf32> to vector<64x256xf32>
    %7 = arith.mulf %5, %6 : vector<64x256xf32>
    %8 = vector.broadcast %2 : vector<64x1xf32> to vector<64x256xf32>
    %9 = arith.addf %7, %8 : vector<64x256xf32>
    %cst_8 = arith.constant 0.000000e+00 : f32
    %10 = vector.broadcast %cst_8 : f32 to vector<64x256xf32>
    %11 = arith.maximumf %9, %10 : vector<64x256xf32>
    %c0_9 = arith.constant 0 : index
    %c0_10 = arith.constant 0 : index
    %c0_11 = arith.constant 0 : index
    %12 = vector.load %arg2[%c0_9, %c0_10, %c0_11] : memref<1x147x256xbf16, #tpu.memory_space<vmem>>, vector<1x147x256xbf16>
    %13 = vector.shape_cast %12 : vector<1x147x256xbf16> to vector<147x256xbf16>
    %cst_12 = arith.constant dense<0.000000e+00> : vector<64x256xf32>
    %14 = tpu.matmul %0, %13, %cst_12 {dimension_numbers = #tpu.dot_dimension_numbers<[1], [0], [0], [1], [0, 0, 1, 1], [], []>} : vector<64x147xbf16>, vector<147x256xbf16>, vector<64x256xf32> -> vector<64x256xf32>
    %15 = vector.broadcast %1 : vector<64x1xf32> to vector<64x256xf32>
    %16 = arith.mulf %14, %15 : vector<64x256xf32>
    %17 = vector.broadcast %2 : vector<64x1xf32> to vector<64x256xf32>
    %18 = arith.addf %16, %17 : vector<64x256xf32>
    %cst_13 = arith.constant 0.000000e+00 : f32
    %19 = vector.broadcast %cst_13 : f32 to vector<64x256xf32>
    %20 = arith.maximumf %18, %19 : vector<64x256xf32>
    %c0_14 = arith.constant 0 : index
    %c0_15 = arith.constant 0 : index
    %c0_16 = arith.constant 0 : index
    %21 = vector.load %arg3[%c0_14, %c0_15, %c0_16] : memref<1x147x256xbf16, #tpu.memory_space<vmem>>, vector<1x147x256xbf16>
    %22 = vector.shape_cast %21 : vector<1x147x256xbf16> to vector<147x256xbf16>
    %cst_17 = arith.constant dense<0.000000e+00> : vector<64x256xf32>
    %23 = tpu.matmul %0, %22, %cst_17 {dimension_numbers = #tpu.dot_dimension_numbers<[1], [0], [0], [1], [0, 0, 1, 1], [], []>} : vector<64x147xbf16>, vector<147x256xbf16>, vector<64x256xf32> -> vector<64x256xf32>
    %24 = vector.broadcast %1 : vector<64x1xf32> to vector<64x256xf32>
    %25 = arith.mulf %23, %24 : vector<64x256xf32>
    %26 = vector.broadcast %2 : vector<64x1xf32> to vector<64x256xf32>
    %27 = arith.addf %25, %26 : vector<64x256xf32>
    %cst_18 = arith.constant 0.000000e+00 : f32
    %28 = vector.broadcast %cst_18 : f32 to vector<64x256xf32>
    %29 = arith.maximumf %27, %28 : vector<64x256xf32>
    %c0_19 = arith.constant 0 : index
    %c0_20 = arith.constant 0 : index
    %c0_21 = arith.constant 0 : index
    %30 = vector.load %arg4[%c0_19, %c0_20, %c0_21] : memref<1x147x256xbf16, #tpu.memory_space<vmem>>, vector<1x147x256xbf16>
    %31 = vector.shape_cast %30 : vector<1x147x256xbf16> to vector<147x256xbf16>
    %cst_22 = arith.constant dense<0.000000e+00> : vector<64x256xf32>
    %32 = tpu.matmul %0, %31, %cst_22 {dimension_numbers = #tpu.dot_dimension_numbers<[1], [0], [0], [1], [0, 0, 1, 1], [], []>} : vector<64x147xbf16>, vector<147x256xbf16>, vector<64x256xf32> -> vector<64x256xf32>
    %33 = vector.broadcast %1 : vector<64x1xf32> to vector<64x256xf32>
    %34 = arith.mulf %32, %33 : vector<64x256xf32>
    %35 = vector.broadcast %2 : vector<64x1xf32> to vector<64x256xf32>
    %36 = arith.addf %34, %35 : vector<64x256xf32>
    %cst_23 = arith.constant 0.000000e+00 : f32
    %37 = vector.broadcast %cst_23 : f32 to vector<64x256xf32>
    %38 = arith.maximumf %36, %37 : vector<64x256xf32>
    %39 = tpu.iota {dimensions = array<i32: 1>} : vector<64x256xi32>
    %c16_i32 = arith.constant 16 : i32
    %c0_i32 = arith.constant 0 : i32
    %40 = arith.cmpi eq, %c16_i32, %c0_i32 : i32
    %c1_i32 = arith.constant 1 : i32
    %41 = arith.select %40, %c1_i32, %c16_i32 : i32
    %42 = vector.broadcast %41 : i32 to vector<64x256xi32>
    %43 = arith.remsi %39, %42 : vector<64x256xi32>
    %c0_i32_24 = arith.constant 0 : i32
    %44 = vector.broadcast %c0_i32_24 : i32 to vector<64x256xi32>
    %45 = arith.cmpi ne, %43, %44 : vector<64x256xi32>
    %c0_i32_25 = arith.constant 0 : i32
    %46 = vector.broadcast %c0_i32_25 : i32 to vector<64x256xi32>
    %47 = arith.cmpi slt, %43, %46 : vector<64x256xi32>
    %c0_i32_26 = arith.constant 0 : i32
    %48 = arith.cmpi slt, %41, %c0_i32_26 : i32
    %49 = vector.broadcast %48 : i1 to vector<64x256xi1>
    %50 = vector.broadcast %49 : vector<64x256xi1> to vector<64x256xi1>
    %51 = arith.xori %47, %50 : vector<64x256xi1>
    %52 = arith.andi %51, %45 : vector<64x256xi1>
    %53 = vector.broadcast %41 : i32 to vector<64x256xi32>
    %54 = arith.addi %43, %53 : vector<64x256xi32>
    %55 = arith.select %52, %54, %43 : vector<64x256xi1>, vector<64x256xi32>
    %c0_i32_27 = arith.constant 0 : i32
    %56 = vector.broadcast %c0_i32_27 : i32 to vector<64x256xi32>
    %57 = arith.cmpi eq, %55, %56 : vector<64x256xi32>
    %cst_28 = arith.constant 0xFF800000 : f32
    %58 = vector.broadcast %cst_28 : f32 to vector<64x1xf32>
    %c0_29 = arith.constant 0 : index
    %c0_30 = arith.constant 0 : index
    %59 = vector.load %arg9[%c0_29, %c0_30] : memref<64x272xf32, #tpu.memory_space<vmem>>, vector<64x1xf32>
    tpu.vector_store %arg9[%c0_29, %c0_30], %58 {strides = array<i32>} : memref<64x272xf32, #tpu.memory_space<vmem>>, vector<64x1xf32>,
    %c0_31 = arith.constant 0 : index
    %c1 = arith.constant 1 : index
    %60 = vector.load %arg9[%c0_31, %c1] : memref<64x272xf32, #tpu.memory_space<vmem>>, vector<64x256xf32>
    tpu.vector_store %arg9[%c0_31, %c1], %20 {strides = array<i32>} : memref<64x272xf32, #tpu.memory_space<vmem>>, vector<64x256xf32>,
    %c0_32 = arith.constant 0 : index
    %c0_33 = arith.constant 0 : index
    %61 = vector.load %arg9[%c0_32, %c0_33] : memref<64x272xf32, #tpu.memory_space<vmem>>, vector<64x256xf32>
    %cst_34 = arith.constant 0xFF800000 : f32
    %62 = vector.broadcast %cst_34 : f32 to vector<64x256xf32>
    %63 = arith.select %57, %62, %61 : vector<64x256xi1>, vector<64x256xf32>
    %64 = arith.maximumf %63, %11 : vector<64x256xf32>
    %65 = arith.maximumf %64, %20 : vector<64x256xf32>
    %cst_35 = arith.constant 0xFF800000 : f32
    %66 = vector.broadcast %cst_35 : f32 to vector<64x1xf32>
    %c0_36 = arith.constant 0 : index
    %c0_37 = arith.constant 0 : index
    %67 = vector.load %arg9[%c0_36, %c0_37] : memref<64x272xf32, #tpu.memory_space<vmem>>, vector<64x1xf32>
    tpu.vector_store %arg9[%c0_36, %c0_37], %66 {strides = array<i32>} : memref<64x272xf32, #tpu.memory_space<vmem>>, vector<64x1xf32>,
    %c0_38 = arith.constant 0 : index
    %c1_39 = arith.constant 1 : index
    %68 = vector.load %arg9[%c0_38, %c1_39] : memref<64x272xf32, #tpu.memory_space<vmem>>, vector<64x256xf32>
    tpu.vector_store %arg9[%c0_38, %c1_39], %38 {strides = array<i32>} : memref<64x272xf32, #tpu.memory_space<vmem>>, vector<64x256xf32>,
    %c0_40 = arith.constant 0 : index
    %c0_41 = arith.constant 0 : index
    %69 = vector.load %arg9[%c0_40, %c0_41] : memref<64x272xf32, #tpu.memory_space<vmem>>, vector<64x256xf32>
    %cst_42 = arith.constant 0xFF800000 : f32
    %70 = vector.broadcast %cst_42 : f32 to vector<64x256xf32>
    %71 = arith.select %57, %70, %69 : vector<64x256xi1>, vector<64x256xf32>
    %72 = arith.maximumf %71, %29 : vector<64x256xf32>
    %73 = arith.maximumf %72, %38 : vector<64x256xf32>
    %cst_43 = arith.constant 0xFF800000 : f32
    %74 = vector.broadcast %cst_43 : f32 to vector<64x16xf32>
    %c0_44 = arith.constant 0 : index
    %c0_45 = arith.constant 0 : index
    %75 = vector.load %arg9[%c0_44, %c0_45] : memref<64x272xf32, #tpu.memory_space<vmem>>, vector<64x16xf32>
    tpu.vector_store %arg9[%c0_44, %c0_45], %74 {strides = array<i32>} : memref<64x272xf32, #tpu.memory_space<vmem>>, vector<64x16xf32>,
    %c0_46 = arith.constant 0 : index
    %c16 = arith.constant 16 : index
    %76 = vector.load %arg9[%c0_46, %c16] : memref<64x272xf32, #tpu.memory_space<vmem>>, vector<64x256xf32>
    tpu.vector_store %arg9[%c0_46, %c16], %73 {strides = array<i32>} : memref<64x272xf32, #tpu.memory_space<vmem>>, vector<64x256xf32>,
    %c0_47 = arith.constant 0 : index
    %c0_48 = arith.constant 0 : index
    %77 = vector.load %arg9[%c0_47, %c0_48] : memref<64x272xf32, #tpu.memory_space<vmem>>, vector<64x256xf32>
    %78 = arith.maximumf %77, %65 : vector<64x256xf32>
    %79 = arith.maximumf %78, %73 : vector<64x256xf32>
    %c0_49 = arith.constant 0 : index
    %c0_50 = arith.constant 0 : index
    %c0_51 = arith.constant 0 : index
    %80 = vector.load %arg8[%c0_49, %c0_50, %c0_51] : memref<1x64x256xf32, #tpu.memory_space<vmem>>, vector<1x64x256xf32>
    %81 = vector.shape_cast %80 : vector<1x64x256xf32> to vector<64x256xf32>
    %82 = vector.shape_cast %79 : vector<64x256xf32> to vector<1x64x256xf32>
    tpu.vector_store %arg8[%c0_49, %c0_50, %c0_51], %82 {strides = array<i32>} : memref<1x64x256xf32, #tpu.memory_space<vmem>>, vector<1x64x256xf32>,
    return
  }
  func.func @transform_0(%arg0: i32) -> (i32, i32, i32) {
    %c0_i32 = arith.constant 0 : i32
    %c0_i32_0 = arith.constant 0 : i32
    %c0_i32_1 = arith.constant 0 : i32
    return %arg0, %c0_i32, %c0_i32_0 : i32, i32, i32
  }
  func.func @transform_1(%arg0: i32) -> (i32, i32, i32) {
    %c0_i32 = arith.constant 0 : i32
    %c0_i32_0 = arith.constant 0 : i32
    %c0_i32_1 = arith.constant 0 : i32
    return %arg0, %c0_i32, %c0_i32_0 : i32, i32, i32
  }
  func.func @transform_2(%arg0: i32) -> (i32, i32, i32) {
    %c0_i32 = arith.constant 0 : i32
    %c0_i32_0 = arith.constant 0 : i32
    %c0_i32_1 = arith.constant 0 : i32
    return %arg0, %c0_i32, %c0_i32_0 : i32, i32, i32
  }
  func.func @transform_3(%arg0: i32) -> (i32, i32, i32) {
    %c0_i32 = arith.constant 0 : i32
    %c0_i32_0 = arith.constant 0 : i32
    %c0_i32_1 = arith.constant 0 : i32
    return %arg0, %c0_i32, %c0_i32_0 : i32, i32, i32
  }
  func.func @transform_4(%arg0: i32) -> (i32, i32) {
    %c0_i32 = arith.constant 0 : i32
    %c0_i32_0 = arith.constant 0 : i32
    %c0_i32_1 = arith.constant 0 : i32
    return %c0_i32, %c0_i32_0 : i32, i32
  }
  func.func @transform_5(%arg0: i32) -> (i32, i32) {
    %c0_i32 = arith.constant 0 : i32
    %c0_i32_0 = arith.constant 0 : i32
    %c0_i32_1 = arith.constant 0 : i32
    return %c0_i32, %c0_i32_0 : i32, i32
  }
  func.func @transform_6(%arg0: i32) -> (i32, i32) {
    %c0_i32 = arith.constant 0 : i32
    %c0_i32_0 = arith.constant 0 : i32
    %c0_i32_1 = arith.constant 0 : i32
    return %c0_i32, %c0_i32_0 : i32, i32
  }
  func.func @transform_7(%arg0: i32) -> (i32, i32, i32) {
    %c0_i32 = arith.constant 0 : i32
    %c0_i32_0 = arith.constant 0 : i32
    %c0_i32_1 = arith.constant 0 : i32
    return %arg0, %c0_i32, %c0_i32_0 : i32, i32, i32
  }
}

</mosaic_0001>

<bundles_post_ra>
// kernel: thermal_moduleA_forward.1
= control target key start
LH: loop header
LB: loop body
LE: loop exit
PB: predicated region body
PF: predicated region fallthrough
CT: control target
= control target key end

     0   :  { %s2428_s24 = smov 0   ;;  %s3475_s0 = inlined_call_operand.vmem [shape: bf16[2,147,256], index: 0, kind: input, shape index: {}]   ;;  %s3476_s1 = inlined_call_operand.vmem [shape: bf16[2,147,256], index: 1, kind: input, shape index: {}]   ;;  %s3477_s2 = inlined_call_operand.vmem [shape: bf16[2,147,256], index: 2, kind: input, shape index: {}]   ;;  %s3478_s3 = inlined_call_operand.vmem [shape: bf16[2,147,256], index: 3, kind: input, shape index: {}]   ;;  %s3479_s4 = inlined_call_operand.vmem [shape: bf16[64,147], index: 4, kind: input, shape index: {}]   ;;  %s3480_s5 = inlined_call_operand.vmem [shape: f32[64,1], index: 5, kind: input, shape index: {}]   ;;  %s3481_s6 = inlined_call_operand.vmem [shape: f32[64,1], index: 6, kind: input, shape index: {}]   ;;  %s3482_s7 = inlined_call_operand.vmem [shape: f32[2,64,256], index: 7, kind: output, shape index: {}]  }
   0x1 LB: > { %s2113_s25 = sadd.s32 4294967295, %s2381_s24   ;;  %p2117_p0 = scmp.ge.s32.totalorder %s2381_s24, 1  ;;  %s2381_s24 = sphi %s2428_s24, %s17_s24  }
   0x2   : > { %p267_p1 = scmp.lt.s32.totalorder %s2381_s24, 3 }
   0x4   : > { %p268_p2 = pnand %p2117_p0, %p267_p1 }
   0x6   : > { %271 = sbr.rel (%p268_p2) target bundleno = 583 (0x247), region = 48 }
   0xb   : > { %p314_p3 = scmp.lt.s32.totalorder %s2113_s25, 1  ;;  %v2439_v0 = vld [vmem:[%s3479_s4 + $0x4] ss:$8 sps:$4 sm:$0xff]   ;;  %vm514_vm0 = vcmask 154624   ;;  %v2383_v1 = vmov 0   ;;  %v350_v3 = vld [vmem:[%s3480_s5 + $0x10] sm:$0xff] }
   0xc   : > { %2152 = vmatprep.mubr.msk.bf16.mxu0 %vm514_vm0, %v2439_v0  ;;  %2176 = vmatprep.mubr.msk.bf16.mxu1 %vm514_vm0, %v2439_v0  ;;  %v348_v2 = vld [vmem:[%s3480_s5] sm:$0xff]  ;;  %v349_v5 = vld [vmem:[%s3480_s5 + $0x8] sm:$0xff]  ;;  %vm527_vm1 = vcmask 1040384   ;;  %vm528_vm2 = vcmask 1041408   ;;  %v2384_v33 = vmov 65535   ;;  %vm1490_vm3 = vcmask 7168  }
   0xd   : > { %s3624_s25 = smov (!%p314_p3, %s2113_s25), 1  ;;  %2245 = vset.pattern.permute.xlu0 %v2383_v1  ;;  %2246 = vset.pattern.permute.xlu1 %v2383_v1  ;;  %v529_v34 = vsel %vm527_vm1, 4294967295, %v2384_v33  ;;  %v2532_v56 = vld [vmem:[%s3479_s4] ss:$8 sps:$4 sm:$0xff]   ;;  %v2541_v61 = vld [vmem:[%s3479_s4 + $0x14] ss:$8 sps:$4 sm:$0xff]  }
   0xe   : > { %s2448_s28 = smul.u32 152, %s3624_s25  ;;  %612 = vperm.xlu0 %2245, %v348_v2   ;;  %622 = vperm.xlu1 %2246, %v350_v3   ;;  %v2515_v41 = vsel %vm528_vm2, %v529_v34, 0  ;;  %v2556_v3 = vld [vmem:[%s3479_s4 + $0x10] ss:$8 sps:$4 sm:$0xff]   ;;  %vm1579_vm4 = vcmask 1047560   ;;  %vm1844_vm7 = vcmask 130048  }
   0xf   : > { %s2387_s27 = smov 16   ;;  %vm1933_vm8 = vcmask 1047680  }
  0x10   : > { %s2454_s8 = scalar_lea.vmem %s3475_s0, %s2448_s28  ;;  %s2460_s11 = scalar_lea.vmem %s3476_s1, %s2448_s28 }
  0x11   : > { %v2247_v4 = vld [vmem:[%s2454_s8 + $0x74] ss:$8 sps:$4 sm:$0xff]   ;;  %v2251_v7 = vld [vmem:[%s2454_s8 + $0x70] ss:$8 sps:$4 sm:$0xff]   ;;  %v2253_v9 = vld [vmem:[%s2454_s8 + $0x64] ss:$8 sps:$4 sm:$0xff]   ;;  %s2503_s20 = scalar_lea.vmem %s3477_s2, %s2448_s28  ;;  %s2513_s23 = scalar_lea.vmem %s3478_s3, %s2448_s28 }
  0x12   : > { %v2249_v6 = vld [vmem:[%s2460_s11 + $0x74] ss:$8 sps:$4 sm:$0xff]   ;;  %537 = vmatprep.subr.bf16.mxu0 %v2247_v4  ;;  %v2252_v8 = vld [vmem:[%s2460_s11 + $0x70] ss:$8 sps:$4 sm:$0xff]   ;;  %v2255_v10 = vld [vmem:[%s2460_s11 + $0x64] ss:$8 sps:$4 sm:$0xff]   ;;  %617 = vperm.xlu0 %2245, %v349_v5  }
  0x13   : > { %858 = vmatprep.subr.bf16.mxu1 %v2249_v6  ;;  %538 = vmatpush1.bf16.msra.mxu0 %v2251_v7  ;;  %v2257_v11 = vld [vmem:[%s2454_s8 + $0x60] ss:$8 sps:$4 sm:$0xff]   ;;  %v2259_v13 = vld [vmem:[%s2454_s8 + $0x54] ss:$8 sps:$4 sm:$0xff]   ;;  %v2263_v15 = vld [vmem:[%s2454_s8 + $0x50] ss:$8 sps:$4 sm:$0xff]  }
  0x14   : > { %859 = vmatpush1.bf16.msra.mxu1 %v2252_v8  ;;  %539 = vmatprep.subr.bf16.mxu0 %v2253_v9  ;;  %v2258_v12 = vld [vmem:[%s2460_s11 + $0x60] ss:$8 sps:$4 sm:$0xff]   ;;  %v2261_v14 = vld [vmem:[%s2460_s11 + $0x54] ss:$8 sps:$4 sm:$0xff]   ;;  %v2264_v16 = vld [vmem:[%s2460_s11 + $0x50] ss:$8 sps:$4 sm:$0xff]  }
  0x15   : > { %860 = vmatprep.subr.bf16.mxu1 %v2255_v10  ;;  %v2265_v17 = vld [vmem:[%s2454_s8 + $0x44] ss:$8 sps:$4 sm:$0xff]   ;;  %v2269_v19 = vld [vmem:[%s2454_s8 + $0x40] ss:$8 sps:$4 sm:$0xff]   ;;  %v2271_v21 = vld [vmem:[%s2454_s8 + $0x34] ss:$8 sps:$4 sm:$0xff]  }
  0x16   : > { %v2267_v18 = vld [vmem:[%s2460_s11 + $0x44] ss:$8 sps:$4 sm:$0xff]   ;;  %v2270_v20 = vld [vmem:[%s2460_s11 + $0x40] ss:$8 sps:$4 sm:$0xff]   ;;  %v2273_v22 = vld [vmem:[%s2460_s11 + $0x34] ss:$8 sps:$4 sm:$0xff]  }
  0x17   : > { %540 = vmatpush1.bf16.msra.mxu0 %v2257_v11  ;;  %v2275_v23 = vld [vmem:[%s2454_s8 + $0x30] ss:$8 sps:$4 sm:$0xff]   ;;  %v2277_v25 = vld [vmem:[%s2454_s8 + $0x24] ss:$8 sps:$4 sm:$0xff]   ;;  %v2281_v27 = vld [vmem:[%s2454_s8 + $0x20] ss:$8 sps:$4 sm:$0xff]  }
  0x18   : > { %861 = vmatpush1.bf16.msra.mxu1 %v2258_v12  ;;  %541 = vmatprep.subr.bf16.mxu0 %v2259_v13  ;;  %v2276_v24 = vld [vmem:[%s2460_s11 + $0x30] ss:$8 sps:$4 sm:$0xff]   ;;  %v2279_v26 = vld [vmem:[%s2460_s11 + $0x24] ss:$8 sps:$4 sm:$0xff]   ;;  %v2282_v28 = vld [vmem:[%s2460_s11 + $0x20] ss:$8 sps:$4 sm:$0xff]  }
  0x19   : > { %862 = vmatprep.subr.bf16.mxu1 %v2261_v14  ;;  %v2283_v29 = vld [vmem:[%s2454_s8 + $0x14] ss:$8 sps:$4 sm:$0xff]   ;;  %v2287_v35 = vld [vmem:[%s2454_s8 + $0x10] ss:$8 sps:$4 sm:$0xff]   ;;  %v2289_v37 = vld [vmem:[%s2454_s8 + $0x4] ss:$8 sps:$4 sm:$0xff]  }
  0x1a   : > { %v2285_v30 = vld [vmem:[%s2460_s11 + $0x14] ss:$8 sps:$4 sm:$0xff]   ;;  %v2288_v36 = vld [vmem:[%s2460_s11 + $0x10] ss:$8 sps:$4 sm:$0xff]   ;;  %v2291_v38 = vld [vmem:[%s2460_s11 + $0x4] ss:$8 sps:$4 sm:$0xff]  }
  0x1b   : > { %542 = vmatpush1.bf16.msra.mxu0 %v2263_v15  ;;  %v382_v31 = vld [vmem:[%s2454_s8 + $0x90] sm:$0x33]  ;;  %v2293_v42 = vld [vmem:[%s2454_s8] ss:$8 sps:$4 sm:$0xff]   ;;  %v2299_v50 = vld [vmem:[%s2454_s8 + $0x84] ss:$8 sps:$4 sm:$0xff]  }
  0x1c   : > { %863 = vmatpush1.bf16.msra.mxu1 %v2264_v16  ;;  %543 = vmatprep.subr.bf16.mxu0 %v2265_v17  ;;  %v756_v32 = vld [vmem:[%s2460_s11 + $0x90] sm:$0x33]  ;;  %v2151_v39 = vcombine.high %v382_v31, %v382_v31  ;;  %v2294_v43 = vld [vmem:[%s2460_s11] ss:$8 sps:$4 sm:$0xff]   ;;  %v2150_v44 = vcombine.low %v382_v31, %v382_v31  ;;  %v2301_v51 = vld [vmem:[%s2460_s11 + $0x84] ss:$8 sps:$4 sm:$0xff]  }
  0x1d   : > { %864 = vmatprep.subr.bf16.mxu1 %v2267_v18  ;;  %v2175_v40 = vcombine.high %v756_v32, %v756_v32  ;;  %v2174_v45 = vcombine.low %v756_v32, %v756_v32  ;;  %v2303_v52 = vld [vmem:[%s2454_s8 + $0x80] ss:$8 sps:$4 sm:$0xff]   ;;  %v2310_v54 = vld [vmem:[%s2503_s20 + $0x74] ss:$8 sps:$4 sm:$0xff]   ;;  %v2308_v57 = vld [vmem:[%s2503_s20 + $0x70] ss:$8 sps:$4 sm:$0xff]  }
  0x1e   : > { %v535_v46 = vand.u32 %v2151_v39, %v2515_v41  ;;  %v532_v48 = vand.u32 %v2150_v44, %v2515_v41  ;;  %v2304_v53 = vld [vmem:[%s2460_s11 + $0x80] ss:$8 sps:$4 sm:$0xff]   ;;  %v2313_v55 = vld [vmem:[%s2513_s23 + $0x74] ss:$8 sps:$4 sm:$0xff]   ;;  %v2311_v58 = vld [vmem:[%s2513_s23 + $0x70] ss:$8 sps:$4 sm:$0xff]  }
  0x1f   : > { %544 = vmatpush1.bf16.msra.mxu0 %v2269_v19  ;;  %v856_v47 = vand.u32 %v2175_v40, %v2515_v41  ;;  %v853_v49 = vand.u32 %v2174_v45, %v2515_v41  ;;  %v2316_v59 = vld [vmem:[%s2503_s20 + $0x64] ss:$8 sps:$4 sm:$0xff]   ;;  %v2314_v62 = vld [vmem:[%s2503_s20 + $0x60] ss:$8 sps:$4 sm:$0xff]   ;;  %v2325_v1 = vld [vmem:[%s2503_s20 + $0x54] ss:$8 sps:$4 sm:$0xff]  }
  0x20   : > { %865 = vmatpush1.bf16.msra.mxu1 %v2270_v20  ;;  %545 = vmatprep.subr.bf16.mxu0 %v2271_v21  ;;  %v2319_v60 = vld [vmem:[%s2513_s23 + $0x64] ss:$8 sps:$4 sm:$0xff]   ;;  %v2317_v63 = vld [vmem:[%s2513_s23 + $0x60] ss:$8 sps:$4 sm:$0xff]   ;;  %v2328_v2 = vld [vmem:[%s2513_s23 + $0x54] ss:$8 sps:$4 sm:$0xff]  }
  0x21   : > { %866 = vmatprep.subr.bf16.mxu1 %v2273_v22  ;;  %v2323_v4 = vld [vmem:[%s2503_s20 + $0x50] ss:$8 sps:$4 sm:$0xff]   ;;  %v2331_v6 = vld [vmem:[%s2503_s20 + $0x44] ss:$8 sps:$4 sm:$0xff]   ;;  %v2329_v11 = vld [vmem:[%s2503_s20 + $0x40] ss:$8 sps:$4 sm:$0xff]  }
  0x22   : > { %v2326_v5 = vld [vmem:[%s2513_s23 + $0x50] ss:$8 sps:$4 sm:$0xff]   ;;  %v2334_v7 = vld [vmem:[%s2513_s23 + $0x44] ss:$8 sps:$4 sm:$0xff]   ;;  %v2332_v12 = vld [vmem:[%s2513_s23 + $0x40] ss:$8 sps:$4 sm:$0xff]  }
  0x23   : > { %546 = vmatpush1.bf16.msra.mxu0 %v2275_v23  ;;  %v351_v8 = vld [vmem:[%s3480_s5 + $0x18] sm:$0xff]  ;;  %v352_v9 = vld [vmem:[%s3480_s5 + $0x20] sm:$0xff]  ;;  %v353_v13 = vld [vmem:[%s3480_s5 + $0x28] sm:$0xff]  ;;  %s2230_s28 = sshll.u32 %s3624_s25, 7 }
  0x24   : > { %867 = vmatpush1.bf16.msra.mxu1 %v2276_v24  ;;  %547 = vmatprep.subr.bf16.mxu0 %v2277_v25  ;;  %v2571_v10 = vld [vmem:[%s3479_s4 + $0x24] ss:$8 sps:$4 sm:$0xff]   ;;  %v354_v14 = vld [vmem:[%s3480_s5 + $0x30] sm:$0xff]  ;;  %v2592_v17 = vld [vmem:[%s3479_s4 + $0x20] ss:$8 sps:$4 sm:$0xff]   ;;  %s3379_s8 = scalar_lea.vmem %s3482_s7, %s2230_s28 }
  0x25   : > { %868 = vmatprep.subr.bf16.mxu1 %v2279_v26  ;;  %627 = vperm.xlu1 %2246, %v351_v8   ;;  %v2340_v15 = vld [vmem:[%s2503_s20 + $0x34] ss:$8 sps:$4 sm:$0xff]   ;;  %v2338_v18 = vld [vmem:[%s2503_s20 + $0x30] ss:$8 sps:$4 sm:$0xff]   ;;  %v2346_v20 = vld [vmem:[%s2503_s20 + $0x24] ss:$8 sps:$4 sm:$0xff]  }
  0x26   : > { %632 = vperm.xlu0 %2245, %v352_v9   ;;  %v2343_v16 = vld [vmem:[%s2513_s23 + $0x34] ss:$8 sps:$4 sm:$0xff]   ;;  %v2341_v19 = vld [vmem:[%s2513_s23 + $0x30] ss:$8 sps:$4 sm:$0xff]   ;;  %v2349_v21 = vld [vmem:[%s2513_s23 + $0x24] ss:$8 sps:$4 sm:$0xff]  }
  0x27   : > { %548 = vmatpush1.bf16.msra.mxu0 %v2281_v27  ;;  %v2601_v22 = vld [vmem:[%s3479_s4 + $0x34] ss:$8 sps:$4 sm:$0xff]   ;;  %v2344_v23 = vld [vmem:[%s2503_s20 + $0x20] ss:$8 sps:$4 sm:$0xff]   ;;  %v2624_v31 = vld [vmem:[%s3479_s4 + $0x30] ss:$8 sps:$4 sm:$0xff]  }
  0x28   : > { %869 = vmatpush1.bf16.msra.mxu1 %v2282_v28  ;;  %549 = vmatprep.subr.bf16.mxu0 %v2283_v29  ;;  %v2347_v24 = vld [vmem:[%s2513_s23 + $0x20] ss:$8 sps:$4 sm:$0xff]   ;;  %v355_v25 = vld [vmem:[%s3480_s5 + $0x38] sm:$0xff]  ;;  %v997_v29 = vld [vmem:[%s2503_s20 + $0x90] sm:$0x33] }
  0x29   : > { %870 = vmatprep.subr.bf16.mxu1 %v2285_v30  ;;  %637 = vperm.xlu1 %2246, %v353_v13   ;;  %v356_v26 = vld [vmem:[%s3481_s6] sm:$0xff]  ;;  %v2355_v27 = vld [vmem:[%s2503_s20 + $0x14] ss:$8 sps:$4 sm:$0xff]   ;;  %v2353_v32 = vld [vmem:[%s2503_s20 + $0x10] ss:$8 sps:$4 sm:$0xff]   ;;  %v2198_v40 = vcombine.low %v997_v29, %v997_v29 }
  0x2a   : > { %642 = vperm.xlu0 %2245, %v354_v14   ;;  %v2358_v28 = vld [vmem:[%s2513_s23 + $0x14] ss:$8 sps:$4 sm:$0xff]   ;;  %v2356_v33 = vld [vmem:[%s2513_s23 + $0x10] ss:$8 sps:$4 sm:$0xff]   ;;  %v2361_v34 = vld [vmem:[%s2503_s20 + $0x4] ss:$8 sps:$4 sm:$0xff]  }
  0x2b   : > { %550 = vmatpush1.bf16.msra.mxu0 %v2287_v35  ;;  %v1238_v30 = vld [vmem:[%s2513_s23 + $0x90] sm:$0x33]  ;;  %v2364_v35 = vld [vmem:[%s2513_s23 + $0x4] ss:$8 sps:$4 sm:$0xff]   ;;  %v2362_v39 = vld [vmem:[%s2513_s23] ss:$8 sps:$4 sm:$0xff]  }
  0x2c   : > { %871 = vmatpush1.bf16.msra.mxu1 %v2288_v36  ;;  %551 = vmatprep.subr.bf16.mxu0 %v2289_v37  ;;  %v2199_v36 = vcombine.high %v997_v29, %v997_v29  ;;  %v2223_v37 = vcombine.high %v1238_v30, %v1238_v30  ;;  %v358_v44 = vld [vmem:[%s3481_s6 + $0x10] sm:$0xff] }
  0x2d   : > { %872 = vmatprep.subr.bf16.mxu1 %v2291_v38  ;;  %647 = vperm.xlu1 %2246, %v355_v25   ;;  %v2359_v38 = vld [vmem:[%s2503_s20] ss:$8 sps:$4 sm:$0xff]  }
  0x2e   : > { %668 = vperm.xlu0 %2245, %v356_v26   ;;  %v1097_v45 = vand.u32 %v2199_v36, %v2515_v41 }
  0x2f   : > { %552 = vmatpush1.bf16.msra.mxu0 %v2293_v42  ;;  %v2222_v42 = vcombine.low %v1238_v30, %v1238_v30 }
  0x30   : > { %873 = vmatpush1.bf16.msra.mxu1 %v2294_v43  ;;  %565 = vmatprep.subr.bf16.mxu0 %v535_v46  ;;  %v357_v43 = vld [vmem:[%s3481_s6 + $0x8] sm:$0xff]  ;;  %v1338_v46 = vand.u32 %v2223_v37, %v2515_v41 }
  0x31   : > { %886 = vmatprep.subr.bf16.mxu1 %v856_v47  ;;  %673 = vperm.xlu1 %2246, %v357_v43   ;;  %v1094_v47 = vand.u32 %v2198_v40, %v2515_v41 }
  0x32   : > { %678 = vperm.xlu0 %2245, %v358_v44  }
  0x33   : > { %566 = vmatpush2.bf16.msra.mxu0 %v532_v48  ;;  %v1335_v48 = vand.u32 %v2222_v42, %v2515_v41  ;;  %v361_v41 = vld [vmem:[%s3481_s6 + $0x28] sm:$0xff] }
  0x34   : > { %887 = vmatpush2.bf16.msra.mxu1 %v853_v49  ;;  %567 = vmatprep.subr.bf16.mxu0 %v2299_v50  ;;  %v359_v49 = vld [vmem:[%s3481_s6 + $0x18] sm:$0xff]  ;;  %v360_v50 = vld [vmem:[%s3481_s6 + $0x20] sm:$0xff] }
  0x35   : > { %888 = vmatprep.subr.bf16.mxu1 %v2301_v51  ;;  %v2374_v51 = vld [vmem:[%s2513_s23 + $0x84] ss:$8 sps:$4 sm:$0xff]   ;;  %683 = vperm.xlu1 %2246, %v359_v49  }
  0x36   : > { %688 = vperm.xlu0 %2245, %v360_v50  }
  0x37   : > { %568 = vmatpush2.bf16.msra.mxu0 %v2303_v52  ;;  %v2369_v52 = vld [vmem:[%s2503_s20 + $0x80] ss:$8 sps:$4 sm:$0xff]  }
  0x38   : > { %889 = vmatpush2.bf16.msra.mxu1 %v2304_v53  ;;  %1099 = vmatprep.subr.bf16.mxu0 %v2310_v54  ;;  %v2372_v53 = vld [vmem:[%s2513_s23 + $0x80] ss:$8 sps:$4 sm:$0xff]   ;;  %v362_v54 = vld [vmem:[%s3481_s6 + $0x30] sm:$0xff]  ;;  %s2386_s23 = smov 1  }
  0x39   : > { %1340 = vmatprep.subr.bf16.mxu1 %v2313_v55  ;;  %693 = vperm.xlu1 %2246, %v361_v41   ;;  %v363_v55 = vld [vmem:[%s3481_s6 + $0x38] sm:$0xff] }
  0x3a   : > { %570 = vmatmul.mubr.bf16.vlgmr.msra.gmra.mxu0 %v2532_v56  ;;  %698 = vperm.xlu0 %2245, %v362_v54  }
  0x3b   : > { %891 = vmatmul.mubr.bf16.vlgmr.msra.gmra.mxu1 %v2532_v56  ;;  %1100 = vmatpush1.bf16.msra.mxu0 %v2308_v57 }
  0x3c   : > { %1341 = vmatpush1.bf16.msra.mxu1 %v2311_v58  ;;  %1101 = vmatprep.subr.bf16.mxu0 %v2316_v59 }
  0x3d   : > { %1342 = vmatprep.subr.bf16.mxu1 %v2319_v60  ;;  %2153 = vmatprep.mubr.msk.bf16.mxu0 %vm514_vm0, %v2541_v61 }
  0x3e   : > { %2177 = vmatprep.mubr.msk.bf16.mxu1 %vm514_vm0, %v2541_v61  ;;  %703 = vperm.xlu1 %2246, %v363_v55  }
  0x3f   : > { %1102 = vmatpush1.bf16.msra.mxu0 %v2314_v62 }
  0x40   : > { %1343 = vmatpush1.bf16.msra.mxu1 %v2317_v63  ;;  %1103 = vmatprep.subr.bf16.mxu0 %v2325_v1 }
  0x41   : > { %1344 = vmatprep.subr.bf16.mxu1 %v2328_v2 }
  0x42   : > { %580 = vmatmul.mubr.bf16.gmra.mxu0 %v2556_v3 }
  0x43   : > { %901 = vmatmul.mubr.bf16.gmra.mxu1 %v2556_v3  ;;  %1104 = vmatpush1.bf16.msra.mxu0 %v2323_v4 }
  0x44   : > { %1345 = vmatpush1.bf16.msra.mxu1 %v2326_v5  ;;  %1105 = vmatprep.subr.bf16.mxu0 %v2331_v6 }
  0x45   : > { %1346 = vmatprep.subr.bf16.mxu1 %v2334_v7  ;;  %2154 = vmatprep.mubr.msk.bf16.mxu0 %vm514_vm0, %v2571_v10 }
  0x46   : > { %2178 = vmatprep.mubr.msk.bf16.mxu1 %vm514_vm0, %v2571_v10 }
  0x47   : > { %1106 = vmatpush1.bf16.msra.mxu0 %v2329_v11 }
  0x48   : > { %1347 = vmatpush1.bf16.msra.mxu1 %v2332_v12  ;;  %1107 = vmatprep.subr.bf16.mxu0 %v2340_v15 }
  0x49   : > { %1348 = vmatprep.subr.bf16.mxu1 %v2343_v16 }
  0x4a   : > { %590 = vmatmul.mubr.bf16.gmra.mxu0 %v2592_v17 }
  0x4b   : > { %911 = vmatmul.mubr.bf16.gmra.mxu1 %v2592_v17  ;;  %1108 = vmatpush1.bf16.msra.mxu0 %v2338_v18 }
  0x4c   : > { %1349 = vmatpush1.bf16.msra.mxu1 %v2341_v19  ;;  %1109 = vmatprep.subr.bf16.mxu0 %v2346_v20 }
  0x4d   : > { %1350 = vmatprep.subr.bf16.mxu1 %v2349_v21  ;;  %2155 = vmatprep.mubr.msk.bf16.mxu0 %vm514_vm0, %v2601_v22 }
  0x4e   : > { %2179 = vmatprep.mubr.msk.bf16.mxu1 %vm514_vm0, %v2601_v22 }
  0x4f   : > { %1110 = vmatpush1.bf16.msra.mxu0 %v2344_v23 }
  0x50   : > { %1351 = vmatpush1.bf16.msra.mxu1 %v2347_v24  ;;  %1111 = vmatprep.subr.bf16.mxu0 %v2355_v27 }
  0x51   : > { %1352 = vmatprep.subr.bf16.mxu1 %v2358_v28 }
  0x52   : > { %600 = vmatmul.mubr.bf16.gmra.mxu0 %v2624_v31 }
  0x53   : > { %921 = vmatmul.mubr.bf16.gmra.mxu1 %v2624_v31  ;;  %1112 = vmatpush1.bf16.msra.mxu0 %v2353_v32 }
  0x54   : > { %1353 = vmatpush1.bf16.msra.mxu1 %v2356_v33  ;;  %1113 = vmatprep.subr.bf16.mxu0 %v2361_v34 }
  0x55   : > { %1354 = vmatprep.subr.bf16.mxu1 %v2364_v35  ;;  %2200 = vmatprep.mubr.msk.bf16.mxu0 %vm514_vm0, %v2439_v0 }
  0x56   : > { %2224 = vmatprep.mubr.msk.bf16.mxu1 %vm514_vm0, %v2439_v0  ;;  %v2371_v0 = vld [vmem:[%s2503_s20 + $0x84] ss:$8 sps:$4 sm:$0xff]  }
  0x57   : > { %1114 = vmatpush1.bf16.msra.mxu0 %v2359_v38 }
  0x58   : > { %1355 = vmatpush1.bf16.msra.mxu1 %v2362_v39  ;;  %1127 = vmatprep.subr.bf16.mxu0 %v1097_v45 }
  0x59   : > { %1368 = vmatprep.subr.bf16.mxu1 %v1338_v46 }
  0x5b   : > { %1128 = vmatpush2.bf16.msra.mxu0 %v1094_v47 }
  0x5c   : > { %1369 = vmatpush2.bf16.msra.mxu1 %v1335_v48  ;;  %1129 = vmatprep.subr.bf16.mxu0 %v2371_v0 }
  0x5d   : > { %1370 = vmatprep.subr.bf16.mxu1 %v2374_v51 }
  0x5f   : > { %1130 = vmatpush2.bf16.msra.mxu0 %v2369_v52 }
  0x60   : > { %1371 = vmatpush2.bf16.msra.mxu1 %v2372_v53 }
  0x62   : > { %1132 = vmatmul.mubr.bf16.vlgmr.msra.gmra.mxu0 %v2532_v56 }
  0x63   : > { %1373 = vmatmul.mubr.bf16.vlgmr.msra.gmra.mxu1 %v2532_v56  ;;  %2201 = vmatprep.mubr.msk.bf16.mxu0 %vm514_vm0, %v2541_v61  ;;  %v3513_v56 = vmov -inf  }
  0x64   : > { %2225 = vmatprep.mubr.msk.bf16.mxu1 %vm514_vm0, %v2541_v61  ;;  %1491 = vst.msk [vmem:[#allocation2] sm:$0xff] %vm1490_vm3, %v3513_v56  ;;  %1492 = vst.msk [vmem:[#allocation2 + $0x18] sm:$0xff] %vm1490_vm3, %v3513_v56 }
  0x65   : > { %1493 = vst.msk [vmem:[#allocation2 + $0x30] sm:$0xff] %vm1490_vm3, %v3513_v56  ;;  %1494 = vst.msk [vmem:[#allocation2 + $0x48] sm:$0xff] %vm1490_vm3, %v3513_v56 }
  0x66   : > { %1495 = vst.msk [vmem:[#allocation2 + $0x60] sm:$0xff] %vm1490_vm3, %v3513_v56  ;;  %1496 = vst.msk [vmem:[#allocation2 + $0x78] sm:$0xff] %vm1490_vm3, %v3513_v56 }
  0x67   : > { %1497 = vst.msk [vmem:[#allocation2 + $0x90] sm:$0xff] %vm1490_vm3, %v3513_v56  ;;  %1498 = vst.msk [vmem:[#allocation2 + $0xa8] sm:$0xff] %vm1490_vm3, %v3513_v56 }
  0x6a   : > { %1142 = vmatmul.mubr.bf16.gmra.mxu0 %v2556_v3 }
  0x6b   : > { %1383 = vmatmul.mubr.bf16.gmra.mxu1 %v2556_v3  ;;  %2202 = vmatprep.mubr.msk.bf16.mxu0 %vm514_vm0, %v2571_v10 }
  0x6c   : > { %2226 = vmatprep.mubr.msk.bf16.mxu1 %vm514_vm0, %v2571_v10 }
  0x72   : > { %1152 = vmatmul.mubr.bf16.gmra.mxu0 %v2592_v17 }
  0x73   : > { %1393 = vmatmul.mubr.bf16.gmra.mxu1 %v2592_v17  ;;  %2203 = vmatprep.mubr.msk.bf16.mxu0 %vm514_vm0, %v2601_v22 }
  0x74   : > { %2227 = vmatprep.mubr.msk.bf16.mxu1 %vm514_vm0, %v2601_v22 }
  0x7a   : > { %1162 = vmatmul.mubr.bf16.gmra.mxu0 %v2624_v31 }
  0x7b   : > { %1403 = vmatmul.mubr.bf16.gmra.mxu1 %v2624_v31 }
  0x89   : > { %v2703_v57 = vpop.permute.xlu0 %612  ;;  %v2705_v58 = vpop.permute.xlu1 %622 }
  0x8d   : > { %v2707_v59 = vpop.permute.xlu0 %617 }
  0xa0   : > { %v2709_v60 = vpop.permute.xlu1 %627 }
  0xa1   : > { %v2711_v61 = vpop.permute.xlu0 %632 }
  0xa4   : > { %v2713_v62 = vpop.permute.xlu1 %637 }
  0xa5   : > { %v2715_v63 = vpop.permute.xlu0 %642 }
  0xa8   : > { %v2717_v2 = vpop.permute.xlu1 %647 }
  0xa9   : > { %v2720_v4 = vpop.permute.xlu0 %668 }
  0xac   : > { %v2731_v13 = vpop.permute.xlu1 %673 }
  0xad   : > { %v2748_v20 = vpop.permute.xlu0 %678 }
  0xb0   : > { %v2764_v29 = vpop.permute.xlu1 %683 }
  0xb1   : > { %v2785_v40 = vpop.permute.xlu0 %688 }
  0xb4   : > { %v2799_v48 = vpop.permute.xlu1 %693 }
  0xb5   : > { %v2815_v55 = vpop.permute.xlu0 %698 }
  0xfb   : > { %v892_v1 = vpop.f32.mrf.mxu1 }
  0xfc   : > { %v931_v3 = vmul.f32 %v892_v1, %v2703_v57 }
  0xfd   : > { %v894_v5 = vpop.f32.mrf.mxu1 }
  0xfe   : > { %v2723_v6 = vadd.f32 %v931_v3, %v2720_v4  ;;  %v932_v7 = vmul.f32 %v894_v5, %v2703_v57 }
  0xff   : > { %v896_v8 = vpop.f32.mrf.mxu1 }
 0x100   : > { %3536 = vst [vmem:[#allocation3_spill] sm:$0xff] %v2723_v6  ;;  %v3496_v9 = vmax.f32 %v2723_v6, 0.0  ;;  %v2728_v10 = vadd.f32 %v932_v7, %v2720_v4  ;;  %v933_v11 = vmul.f32 %v896_v8, %v2707_v59 }
 0x101   : > { %v898_v12 = vpop.f32.mrf.mxu1 }
 0x102   : > { %3537 = vst [vmem:[#allocation4_spill] sm:$0xff] %v2728_v10  ;;  %v3498_v14 = vmax.f32 %v2728_v10, 0.0  ;;  %v934_v15 = vmul.f32 %v898_v12, %v2707_v59  ;;  %1515 = vrot.lane.b32.xlu0 %v3496_v9, %s2386_s23  ;;  %v2739_v16 = vadd.f32 %v933_v11, %v2731_v13 }
 0x103   : > { %v902_v17 = vpop.f32.mrf.mxu1 }
 0x104   : > { %3538 = vst [vmem:[#allocation5_spill] sm:$0xff] %v2739_v16  ;;  %v2742_v18 = vadd.f32 %v934_v15, %v2731_v13  ;;  %v935_v19 = vmul.f32 %v902_v17, %v2705_v58  ;;  %1517 = vrot.lane.b32.xlu1 %v3498_v14, %s2386_s23  ;;  %v3494_v21 = vmax.f32 %v2739_v16, 0.0 }
 0x105   : > { %v904_v22 = vpop.f32.mrf.mxu1 }
 0x106   : > { %3539 = vst [vmem:[#allocation6_spill] sm:$0xff] %v2742_v18  ;;  %v3497_v23 = vmax.f32 %v2742_v18, 0.0  ;;  %v2753_v24 = vadd.f32 %v935_v19, %v2748_v20  ;;  %v936_v25 = vmul.f32 %v904_v22, %v2705_v58  ;;  %1519 = vrot.lane.b32.xlu0 %v3494_v21, %s2386_s23  ;;  %v2839_v22 = vpop.permute.xlu1 %703 }
 0x107   : > { %v906_v26 = vpop.f32.mrf.mxu1 }
 0x108   : > { %3540 = vst [vmem:[#allocation7_spill] sm:$0xff] %v2753_v24  ;;  %v3492_v27 = vmax.f32 %v2753_v24, 0.0  ;;  %v937_v28 = vmul.f32 %v906_v26, %v2709_v60  ;;  %1521 = vrot.lane.b32.xlu1 %v3497_v23, %s2386_s23  ;;  %v2767_v30 = vadd.f32 %v936_v25, %v2748_v20 }
 0x109   : > { %v908_v31 = vpop.f32.mrf.mxu1 }
 0x10a   : > { %3541 = vst [vmem:[#allocation8_spill] sm:$0xff] %v2767_v30  ;;  %v2770_v32 = vadd.f32 %v937_v28, %v2764_v29  ;;  %v938_v33 = vmul.f32 %v908_v31, %v2709_v60  ;;  %v3495_v34 = vmax.f32 %v2767_v30, 0.0  ;;  %1523 = vrot.lane.b32.xlu0 %v3492_v27, %s2386_s23 }
 0x10b   : > { %v912_v35 = vpop.f32.mrf.mxu1 }
 0x10c   : > { %3542 = vst [vmem:[#allocation9_spill] sm:$0xff] %v2770_v32  ;;  %v3490_v36 = vmax.f32 %v2770_v32, 0.0  ;;  %v2779_v37 = vadd.f32 %v938_v33, %v2764_v29  ;;  %v939_v38 = vmul.f32 %v912_v35, %v2711_v61  ;;  %1525 = vrot.lane.b32.xlu1 %v3495_v34, %s2386_s23 }
 0x10d   : > { %v914_v39 = vpop.f32.mrf.mxu1 }
 0x10e   : > { %3543 = vst [vmem:[#allocation10_spill] sm:$0xff] %v2779_v37  ;;  %v3493_v42 = vmax.f32 %v2779_v37, 0.0  ;;  %v940_v43 = vmul.f32 %v914_v39, %v2711_v61  ;;  %v2790_v44 = vadd.f32 %v939_v38, %v2785_v40  ;;  %1527 = vrot.lane.b32.xlu0 %v3490_v36, %s2386_s23 }
 0x10f   : > { %v916_v45 = vpop.f32.mrf.mxu1 }
 0x110   : > { %3544 = vst [vmem:[#allocation11_spill] sm:$0xff] %v2790_v44  ;;  %v2796_v46 = vadd.f32 %v940_v43, %v2785_v40  ;;  %v941_v47 = vmul.f32 %v916_v45, %v2713_v62  ;;  %v3488_v49 = vmax.f32 %v2790_v44, 0.0  ;;  %1529 = vrot.lane.b32.xlu1 %v3493_v42, %s2386_s23 }
 0x111   : > { %v918_v50 = vpop.f32.mrf.mxu1 }
 0x112   : > { %3545 = vst [vmem:[#allocation12_spill] sm:$0xff] %v2796_v46  ;;  %v3491_v0 = vmax.f32 %v2796_v46, 0.0  ;;  %v2807_v51 = vadd.f32 %v941_v47, %v2799_v48  ;;  %v942_v52 = vmul.f32 %v918_v50, %v2713_v62  ;;  %1531 = vrot.lane.b32.xlu0 %v3488_v49, %s2386_s23 }
 0x113   : > { %v922_v53 = vpop.f32.mrf.mxu1 }
 0x114   : > { %3546 = vst [vmem:[#allocation13_spill] sm:$0xff] %v2807_v51  ;;  %v3486_v41 = vmax.f32 %v2807_v51, 0.0  ;;  %v943_v54 = vmul.f32 %v922_v53, %v2715_v63  ;;  %v2818_v1 = vadd.f32 %v942_v52, %v2799_v48  ;;  %1533 = vrot.lane.b32.xlu1 %v3491_v0, %s2386_s23 }
 0x115   : > { %v924_v3 = vpop.f32.mrf.mxu1 }
 0x116   : > { %3547 = vst [vmem:[#allocation14_spill] sm:$0xff] %v2818_v1  ;;  %v2824_v5 = vadd.f32 %v943_v54, %v2815_v55  ;;  %v944_v7 = vmul.f32 %v924_v3, %v2715_v63  ;;  %v3489_v8 = vmax.f32 %v2818_v1, 0.0  ;;  %1535 = vrot.lane.b32.xlu0 %v3486_v41, %s2386_s23 }
 0x117   : > { %v926_v11 = vpop.f32.mrf.mxu1 }
 0x118   : > { %3548 = vst [vmem:[#allocation15_spill] sm:$0xff] %v2824_v5  ;;  %v3484_v12 = vmax.f32 %v2824_v5, 0.0  ;;  %v2833_v15 = vadd.f32 %v944_v7, %v2815_v55  ;;  %v945_v17 = vmul.f32 %v926_v11, %v2717_v2  ;;  %1537 = vrot.lane.b32.xlu1 %v3489_v8, %s2386_s23  ;;  %v571_v8 = vpop.f32.mrf.mxu0 }
 0x119   : > { %v928_v19 = vpop.f32.mrf.mxu1  ;;  %v650_v32 = vmul.f32 %v2703_v57, %v571_v8 }
 0x11a   : > { %3549 = vst [vmem:[#allocation16_spill] sm:$0xff] %v2833_v15  ;;  %v3487_v25 = vmax.f32 %v2833_v15, 0.0  ;;  %v946_v26 = vmul.f32 %v928_v19, %v2717_v2  ;;  %v2844_v28 = vadd.f32 %v945_v17, %v2839_v22  ;;  %1539 = vrot.lane.b32.xlu0 %v3484_v12, %s2386_s23  ;;  %v573_v21 = vpop.f32.mrf.mxu0 }
 0x11b   : > { %v706_v16 = vadd.f32 %v2720_v4, %v650_v32 }
 0x11c   : > { %3550 = vst [vmem:[#allocation17_spill] sm:$0xff] %v2844_v28  ;;  %v2850_v31 = vadd.f32 %v946_v26, %v2839_v22  ;;  %v3483_v33 = vmax.f32 %v2844_v28, 0.0  ;;  %1541 = vrot.lane.b32.xlu1 %v3487_v25, %s2386_s23 }
 0x11e   : > { %3551 = vst [vmem:[#allocation18_spill] sm:$0xff] %v2850_v31  ;;  %v3485_v35 = vmax.f32 %v2850_v31, 0.0  ;;  %1543 = vrot.lane.b32.xlu0 %v3483_v33, %s2386_s23  ;;  %v651_v31 = vmul.f32 %v2703_v57, %v573_v21 }
 0x120   : > { %1545 = vrot.lane.b32.xlu1 %v3485_v35, %s2386_s23  ;;  %v707_v15 = vadd.f32 %v2720_v4, %v651_v31 }
 0x122   : > { %v723_v37 = vmax.f32 %v707_v15, 0.0 }
 0x123   : > { %v1374_v38 = vpop.f32.mrf.mxu1 }
 0x124   : > { %v1413_v39 = vmul.f32 %v1374_v38, %v2703_v57 }
 0x125   : > { %v1376_v43 = vpop.f32.mrf.mxu1 }
 0x126   : > { %v2865_v45 = vadd.f32 %v1413_v39, %v2720_v4  ;;  %v1414_v47 = vmul.f32 %v1376_v43, %v2703_v57 }
 0x127   : > { %v1378_v50 = vpop.f32.mrf.mxu1 }
 0x128   : > { %v3509_v52 = vmax.f32 %v2865_v45, 0.0  ;;  %v2870_v53 = vadd.f32 %v1414_v47, %v2720_v4  ;;  %v1415_v54 = vmul.f32 %v1378_v50, %v2707_v59 }
 0x129   : > { %v1380_v3 = vpop.f32.mrf.mxu1 }
 0x12a   : > { %v3512_v7 = vmax.f32 %v2870_v53, 0.0  ;;  %v1416_v11 = vmul.f32 %v1380_v3, %v2707_v59  ;;  %1692 = vrot.lane.b32.xlu0 %v3509_v52, %s2386_s23  ;;  %v2879_v17 = vadd.f32 %v1415_v54, %v2731_v13 }
 0x12b   : > { %v1384_v19 = vpop.f32.mrf.mxu1 }
 0x12c   : > { %v2882_v26 = vadd.f32 %v1416_v11, %v2731_v13  ;;  %v1417_v38 = vmul.f32 %v1384_v19, %v2705_v58  ;;  %1694 = vrot.lane.b32.xlu1 %v3512_v7, %s2386_s23  ;;  %v3504_v39 = vmax.f32 %v2879_v17, 0.0  ;;  %v1461_v7 = vlaneseq }
 0x12d   : > { %v1386_v43 = vpop.f32.mrf.mxu1 }
 0x12e   : > { %v3510_v47 = vmax.f32 %v2882_v26, 0.0  ;;  %v2891_v50 = vadd.f32 %v1417_v38, %v2748_v20  ;;  %v1418_v54 = vmul.f32 %v1386_v43, %v2705_v58  ;;  %1696 = vrot.lane.b32.xlu0 %v3504_v39, %s2386_s23  ;;  %v1462_v28 = vand.u32 127, %v1461_v7 }
 0x12f   : > { %v1388_v3 = vpop.f32.mrf.mxu1 }
 0x130   : > { %v3501_v11 = vmax.f32 %v2891_v50, 0.0  ;;  %v1419_v19 = vmul.f32 %v1388_v3, %v2709_v60  ;;  %1698 = vrot.lane.b32.xlu1 %v3510_v47, %s2386_s23  ;;  %v2903_v33 = vadd.f32 %v1418_v54, %v2748_v20 }
 0x131   : > { %v1390_v38 = vpop.f32.mrf.mxu1 }
 0x132   : > { %v2906_v12 = vadd.f32 %v1419_v19, %v2764_v29  ;;  %v1420_v43 = vmul.f32 %v1390_v38, %v2709_v60  ;;  %v3508_v35 = vmax.f32 %v2903_v33, 0.0  ;;  %1700 = vrot.lane.b32.xlu0 %v3501_v11, %s2386_s23 }
 0x133   : > { %v1394_v3 = vpop.f32.mrf.mxu1 }
 0x134   : > { %v3499_v41 = vmax.f32 %v2906_v12, 0.0  ;;  %v2915_v25 = vadd.f32 %v1420_v43, %v2764_v29  ;;  %v1421_v54 = vmul.f32 %v1394_v3, %v2711_v61  ;;  %1702 = vrot.lane.b32.xlu1 %v3508_v35, %s2386_s23 }
 0x135   : > { %v1396_v19 = vpop.f32.mrf.mxu1 }
 0x136   : > { %v3503_v38 = vmax.f32 %v2915_v25, 0.0  ;;  %v1422_v49 = vmul.f32 %v1396_v19, %v2711_v61  ;;  %v2924_v36 = vadd.f32 %v1421_v54, %v2785_v40  ;;  %1704 = vrot.lane.b32.xlu0 %v3499_v41, %s2386_s23  ;;  %v575_v41 = vpop.f32.mrf.mxu0 }
 0x137   : > { %v1398_v43 = vpop.f32.mrf.mxu1  ;;  %v652_v6 = vmul.f32 %v2707_v59, %v575_v41 }
 0x138   : > { %v2930_v3 = vadd.f32 %v1422_v49, %v2785_v40  ;;  %v1423_v0 = vmul.f32 %v1398_v43, %v2713_v62  ;;  %v3500_v27 = vmax.f32 %v2924_v36, 0.0  ;;  %1706 = vrot.lane.b32.xlu1 %v3503_v38, %s2386_s23  ;;  %v577_v39 = vpop.f32.mrf.mxu0 }
 0x139   : > { %v1400_v19 = vpop.f32.mrf.mxu1  ;;  %v653_v44 = vmul.f32 %v2707_v59, %v577_v39 }
 0x13a   : > { %v3502_v54 = vmax.f32 %v2930_v3, 0.0  ;;  %v2939_v42 = vadd.f32 %v1423_v0, %v2799_v48  ;;  %v1424_v34 = vmul.f32 %v1400_v19, %v2713_v62  ;;  %1708 = vrot.lane.b32.xlu0 %v3500_v27, %s2386_s23 }
 0x13b   : > { %v1404_v49 = vpop.f32.mrf.mxu1  ;;  %v709_v31 = vadd.f32 %v2731_v13, %v653_v44 }
 0x13c   : > { %v3505_v43 = vmax.f32 %v2939_v42, 0.0  ;;  %v1425_v9 = vmul.f32 %v1404_v49, %v2715_v63  ;;  %v2948_v23 = vadd.f32 %v1424_v34, %v2799_v48  ;;  %1710 = vrot.lane.b32.xlu1 %v3502_v54, %s2386_s23 }
 0x13d   : > { %v1406_v0 = vpop.f32.mrf.mxu1  ;;  %v725_v32 = vmax.f32 %v709_v31, 0.0 }
 0x13e   : > { %v2954_v14 = vadd.f32 %v1425_v9, %v2815_v55  ;;  %v1426_v19 = vmul.f32 %v1406_v0, %v2715_v63  ;;  %v3506_v27 = vmax.f32 %v2948_v23, 0.0  ;;  %1712 = vrot.lane.b32.xlu0 %v3505_v43, %s2386_s23 }
 0x13f   : > { %v1408_v49 = vpop.f32.mrf.mxu1 }
 0x140   : > { %3552 = vst [vmem:[#allocation19_spill] sm:$0xff] %v2954_v14  ;;  %v3507_v34 = vmax.f32 %v2954_v14, 0.0  ;;  %v2963_v11 = vadd.f32 %v1426_v19, %v2815_v55  ;;  %v1427_v54 = vmul.f32 %v1408_v49, %v2717_v2  ;;  %1714 = vrot.lane.b32.xlu1 %v3506_v27, %s2386_s23 }
 0x141   : > { %v1410_v9 = vpop.f32.mrf.mxu1 }
 0x142   : > { %v3511_v0 = vmax.f32 %v2963_v11, 0.0  ;;  %v1428_v38 = vmul.f32 %v1410_v9, %v2717_v2  ;;  %v2972_v43 = vadd.f32 %v1427_v54, %v2839_v22  ;;  %1716 = vrot.lane.b32.xlu0 %v3507_v34, %s2386_s23  ;;  %v581_v9 = vpop.f32.mrf.mxu0 }
 0x144   : > { %3553 = vst [vmem:[#allocation20_spill] sm:$0xff] %v2972_v43  ;;  %v2978_v19 = vadd.f32 %v1428_v38, %v2839_v22  ;;  %v3517_v49 = vmax.f32 %v2972_v43, 0.0  ;;  %1718 = vrot.lane.b32.xlu1 %v3511_v0, %s2386_s23  ;;  %v583_v54 = vpop.f32.mrf.mxu0 }
 0x145   : > { %v655_v8 = vmul.f32 %v2705_v58, %v583_v54 }
 0x146   : > { %3554 = vst [vmem:[#allocation21_spill] sm:$0xff] %v2978_v19  ;;  %v3519_v27 = vmax.f32 %v2978_v19, 0.0  ;;  %1720 = vrot.lane.b32.xlu0 %v3517_v49, %s2386_s23  ;;  %v585_v38 = vpop.f32.mrf.mxu0  ;;  %v1463_v49 = vadd.s32 128, %v1462_v28 }
 0x147   : > { %v711_v54 = vadd.f32 %v2748_v20, %v655_v8  ;;  %v656_v14 = vmul.f32 %v2709_v60, %v585_v38 }
 0x148   : > { %1722 = vrot.lane.b32.xlu1 %v3519_v27, %s2386_s23  ;;  %v587_v34 = vpop.f32.mrf.mxu0  ;;  %v1475_v51 = vand.u32 15, %v1463_v49  ;;  %v1468_v49 = vand.u32 15, %v1462_v28  ;;  %v722_v28 = vmax.f32 %v706_v16, 0.0 }
 0x149   : > { %v657_v41 = vmul.f32 %v2709_v60, %v587_v34 }
 0x14a   : > { %v2991_v35 = vpop.f32.mrf.mxu0  ;;  %vm3012_vm5 = vcmp.eq.s32.totalorder %v1475_v51, 0  ;;  %vm3028_vm6 = vcmp.eq.s32.totalorder %v1468_v49, 0 }
 0x14c   : > { %v593_v52 = vpop.f32.mrf.mxu0 }
 0x14e   : > { %v2993_v47 = vpop.f32.mrf.mxu0 }
 0x150   : > { %v2995_v0 = vpop.f32.mrf.mxu0 }
 0x152   : > { %v2997_v56 = vpop.f32.mrf.mxu0 }
 0x154   : > { %v2999_v5 = vpop.f32.mrf.mxu0 }
 0x156   : > { %v3002_v27 = vpop.f32.mrf.mxu0 }
 0x158   : > { %v3006_v1 = vpop.f32.mrf.mxu0 }
 0x15a   : > { %v3009_v24 = vpop.f32.mrf.mxu0 }
 0x15c   : > { %v3023_v51 = vpop.f32.mrf.mxu0 }
 0x15e   : > { %v3039_v49 = vpop.f32.mrf.mxu0 }
 0x160   : > { %v3055_v19 = vpop.f32.mrf.mxu0 }
 0x174   : > { %v1516_v46 = vpop.permute.xlu0 %1515 }
 0x175   : > { %1580 = vst.msk [vmem:[#allocation2] sm:$0xff] %vm1579_vm4, %v1516_v46 }
 0x176   : > { %v1518_v21 = vpop.permute.xlu1 %1517 }
 0x177   : > { %v1547_v39 = vsel %vm1490_vm3, %v1516_v46, %v1518_v21 }
 0x178   : > { %v1621_v30 = vsel %vm3012_vm5, -inf, %v1547_v39  ;;  %v1520_v18 = vpop.permute.xlu0 %1519  ;;  %v654_v39 = vmul.f32 %v2705_v58, %v581_v9  ;;  %v659_v9 = vmul.f32 %v2711_v61, %v593_v52 }
 0x179   : > { %v3025_v10 = vmax.f32 %v1621_v30, %v723_v37  ;;  %1583 = vst.msk [vmem:[#allocation2 + $0x18] sm:$0xff] %vm1579_vm4, %v1520_v18  ;;  %v708_v37 = vadd.f32 %v2731_v13, %v652_v6  ;;  %v713_v6 = vadd.f32 %v2764_v29, %v657_v41 }
 0x17a   : > { %v1522_v15 = vpop.permute.xlu1 %1521 }
 0x17b   : > { %3557 = vst [vmem:[#allocation22_spill] sm:$0xff] %v3025_v10  ;;  %v1548_v46 = vsel %vm1490_vm3, %v1520_v18, %v1522_v15  ;;  %v3560_v18 = vmov -inf   ;;  %v727_v15 = vmax.f32 %v711_v54, 0.0  ;;  %v724_v43 = vmax.f32 %v708_v37, 0.0 }
 0x17c   : > { %v1604_v21 = vld [vmem:[#allocation2] sm:$0xff]  ;;  %v1623_v30 = vsel %vm3012_vm5, -inf, %v1548_v46  ;;  %v1524_v10 = vpop.permute.xlu0 %1523  ;;  %v729_v38 = vmax.f32 %v713_v6, 0.0  ;;  %v715_v37 = vadd.f32 %v2785_v40, %v659_v9 }
 0x17d   : > { %v1620_v31 = vsel %vm3028_vm6, -inf, %v1604_v21  ;;  %1668 = vst.msk [vmem:[#allocation2] sm:$0xff] %vm1490_vm3, %v3560_v18  ;;  %v3045_v16 = vmax.f32 %v1623_v30, %v725_v32  ;;  %v710_v21 = vadd.f32 %v2748_v20, %v654_v39  ;;  %v661_v39 = vmul.f32 %v2713_v62, %v2995_v0 }
 0x17e   : > { %1586 = vst.msk [vmem:[#allocation2 + $0x30] sm:$0xff] %vm1579_vm4, %v1524_v10  ;;  %v3048_v34 = vmax.f32 %v1620_v31, %v722_v28  ;;  %v1526_v8 = vpop.permute.xlu1 %1525 }
 0x17f   : > { %v1549_v46 = vsel %vm1490_vm3, %v1524_v10, %v1526_v8  ;;  %v726_v8 = vmax.f32 %v710_v21, 0.0  ;;  %v717_v21 = vadd.f32 %v2799_v48, %v661_v39 }
 0x180   : > { %3561 = vst [vmem:[#allocation23_spill] sm:$0xff] %v3048_v34  ;;  %v1528_v32 = vpop.permute.xlu0 %1527  ;;  %v1606_v30 = vld [vmem:[#allocation2 + $0x18] sm:$0xff]  ;;  %v1625_v28 = vsel %vm3012_vm5, -inf, %v1549_v46  ;;  %v712_v46 = vadd.f32 %v2764_v29, %v656_v14  ;;  %v3075_v34 = vpop.f32.mrf.mxu0 }
 0x181   : > { %1589 = vst.msk [vmem:[#allocation2 + $0x48] sm:$0xff] %vm1579_vm4, %v1528_v32  ;;  %v1622_v54 = vsel %vm3028_vm6, -inf, %v1606_v30  ;;  %v3064_v10 = vmax.f32 %v1625_v28, %v727_v15  ;;  %v658_v30 = vmul.f32 %v2711_v61, %v2991_v35  ;;  %v731_v35 = vmax.f32 %v715_v37, 0.0 }
 0x182   : > { %1669 = vst.msk [vmem:[#allocation2 + $0x18] sm:$0xff] %vm1490_vm3, %v3560_v18  ;;  %v1530_v52 = vpop.permute.xlu1 %1529  ;;  %v3066_v41 = vmax.f32 %v1622_v54, %v724_v43 }
 0x183   : > { %v1550_v31 = vsel %vm1490_vm3, %v1528_v32, %v1530_v52  ;;  %v663_v32 = vmul.f32 %v2715_v63, %v2999_v5  ;;  %v728_v52 = vmax.f32 %v712_v46, 0.0 }
 0x184   : > { %3562 = vst [vmem:[#allocation24_spill] sm:$0xff] %v3066_v41  ;;  %v1532_v15 = vpop.permute.xlu0 %1531  ;;  %v1627_v43 = vsel %vm3012_vm5, -inf, %v1550_v31  ;;  %v714_v31 = vadd.f32 %v2785_v40, %v658_v30  ;;  %v3095_v41 = vpop.f32.mrf.mxu0 }
 0x185   : > { %v1608_v28 = vld [vmem:[#allocation2 + $0x30] sm:$0xff]  ;;  %1592 = vst.msk [vmem:[#allocation2 + $0x60] sm:$0xff] %vm1579_vm4, %v1532_v15  ;;  %v3084_v6 = vmax.f32 %v1627_v43, %v729_v38  ;;  %v719_v30 = vadd.f32 %v2815_v55, %v663_v32 }
 0x186   : > { %v1624_v0 = vsel %vm3028_vm6, -inf, %v1608_v28  ;;  %1670 = vst.msk [vmem:[#allocation2 + $0x30] sm:$0xff] %vm1490_vm3, %v3560_v18  ;;  %v1534_v14 = vpop.permute.xlu1 %1533  ;;  %v660_v28 = vmul.f32 %v2713_v62, %v2993_v47  ;;  %v733_v47 = vmax.f32 %v717_v21, 0.0 }
 0x187   : > { %v3086_v9 = vmax.f32 %v1624_v0, %v726_v8  ;;  %v1551_v54 = vsel %vm1490_vm3, %v1532_v15, %v1534_v14  ;;  %v665_v15 = vmul.f32 %v2717_v2, %v3006_v1  ;;  %v730_v14 = vmax.f32 %v714_v31, 0.0 }
 0x188   : > { %v1536_v38 = vpop.permute.xlu0 %1535  ;;  %v1610_v43 = vld [vmem:[#allocation2 + $0x48] sm:$0xff]  ;;  %v1629_v37 = vsel %vm3012_vm5, -inf, %v1551_v54  ;;  %v716_v54 = vadd.f32 %v2799_v48, %v660_v28 }
 0x189   : > { %3563 = vst [vmem:[#allocation25_spill] sm:$0xff] %v3086_v9  ;;  %1595 = vst.msk [vmem:[#allocation2 + $0x78] sm:$0xff] %vm1579_vm4, %v1536_v38  ;;  %v1626_v5 = vsel %vm3028_vm6, -inf, %v1610_v43  ;;  %v3104_v39 = vmax.f32 %v1629_v37, %v731_v35  ;;  %v662_v43 = vmul.f32 %v2715_v63, %v2997_v56  ;;  %v3115_v9 = vpop.f32.mrf.mxu0  ;;  %v735_v56 = vmax.f32 %v719_v30, 0.0 }
 0x18a   : > { %1671 = vst.msk [vmem:[#allocation2 + $0x48] sm:$0xff] %vm1490_vm3, %v3560_v18  ;;  %v1538_v8 = vpop.permute.xlu1 %1537  ;;  %v3106_v46 = vmax.f32 %v1626_v5, %v728_v52  ;;  %v721_v28 = vadd.f32 %v2839_v22, %v665_v15  ;;  %v732_v5 = vmax.f32 %v716_v54, 0.0 }
 0x18b   : > { %3564 = vst [vmem:[#allocation26_spill] sm:$0xff] %v3104_v39  ;;  %v1552_v0 = vsel %vm1490_vm3, %v1536_v38, %v1538_v8  ;;  %v718_v8 = vadd.f32 %v2815_v55, %v662_v43 }
 0x18c   : > { %3565 = vst [vmem:[#allocation27_spill] sm:$0xff] %v3106_v46  ;;  %v1540_v35 = vpop.permute.xlu0 %1539  ;;  %v1612_v37 = vld [vmem:[#allocation2 + $0x60] sm:$0xff]  ;;  %v1631_v21 = vsel %vm3012_vm5, -inf, %v1552_v0  ;;  %v664_v0 = vmul.f32 %v2717_v2, %v3002_v27  ;;  %v737_v27 = vmax.f32 %v721_v28, 0.0 }
 0x18d   : > { %1598 = vst.msk [vmem:[#allocation2 + $0x90] sm:$0xff] %vm1579_vm4, %v1540_v35  ;;  %v1628_v1 = vsel %vm3028_vm6, -inf, %v1612_v37  ;;  %v3124_v32 = vmax.f32 %v1631_v21, %v733_v47  ;;  %v1149_v37 = vpop.f32.mrf.mxu0 }
 0x18e   : > { %1672 = vst.msk [vmem:[#allocation2 + $0x60] sm:$0xff] %vm1490_vm3, %v3560_v18  ;;  %v1542_v52 = vpop.permute.xlu1 %1541  ;;  %v3126_v31 = vmax.f32 %v1628_v1, %v730_v14  ;;  %v720_v21 = vadd.f32 %v2839_v22, %v664_v0 }
 0x18f   : > { %v1553_v38 = vsel %vm1490_vm3, %v1540_v35, %v1542_v52  ;;  %v734_v35 = vmax.f32 %v718_v8, 0.0  ;;  %v3146_v1 = vpop.f32.mrf.mxu0 }
 0x190   : > { %v1544_v46 = vpop.permute.xlu0 %1543  ;;  %v1614_v39 = vld [vmem:[#allocation2 + $0x78] sm:$0xff]  ;;  %v1633_v47 = vsel %vm3012_vm5, -inf, %v1553_v38 }
 0x191   : > { %1601 = vst.msk [vmem:[#allocation2 + $0xa8] sm:$0xff] %vm1579_vm4, %v1544_v46  ;;  %v1630_v30 = vsel %vm3028_vm6, -inf, %v1614_v39  ;;  %v3140_v15 = vmax.f32 %v1633_v47, %v735_v56  ;;  %v1155_v8 = vpop.f32.mrf.mxu0 }
 0x192   : > { %1673 = vst.msk [vmem:[#allocation2 + $0x78] sm:$0xff] %vm1490_vm3, %v3560_v18  ;;  %v1546_v14 = vpop.permute.xlu1 %1545  ;;  %v3142_v54 = vmax.f32 %v1630_v30, %v732_v5  ;;  %v736_v5 = vmax.f32 %v720_v21, 0.0 }
 0x193   : > { %v1554_v43 = vsel %vm1490_vm3, %v1544_v46, %v1546_v14  ;;  %v1173_v46 = vmul.f32 %v3023_v51, %v2703_v57  ;;  %v1175_v14 = vmul.f32 %v3055_v19, %v2707_v59  ;;  %v1172_v51 = vmul.f32 %v3009_v24, %v2703_v57 }
 0x194   : > { %v1616_v52 = vld [vmem:[#allocation2 + $0x90] sm:$0xff]  ;;  %v1635_v39 = vsel %vm3012_vm5, -inf, %v1554_v43  ;;  %v1174_v57 = vmul.f32 %v3039_v49, %v2707_v59  ;;  %v1179_v59 = vmul.f32 %v1149_v37, %v2709_v60 }
 0x195   : > { %v1632_v38 = vsel %vm3028_vm6, -inf, %v1616_v52  ;;  %1674 = vst.msk [vmem:[#allocation2 + $0x90] sm:$0xff] %vm1490_vm3, %v3560_v18  ;;  %v3154_v56 = vmax.f32 %v1635_v39, %v737_v27  ;;  %v1189_v30 = vadd.f32 %v1173_v46, %v2720_v4  ;;  %v1191_v39 = vadd.f32 %v1175_v14, %v2731_v13 }
 0x196   : > { %v3158_v28 = vmax.f32 %v1632_v38, %v734_v35  ;;  %v3171_v35 = vpop.f32.mrf.mxu0  ;;  %v1177_v38 = vmul.f32 %v3095_v41, %v2705_v58  ;;  %v1188_v19 = vadd.f32 %v1172_v51, %v2720_v4  ;;  %v3566_v51 = vmax.f32 %v2870_v53, 0.0 }
 0x197   : > { %v1205_v52 = vmax.f32 %v1189_v30, 0.0  ;;  %v1176_v30 = vmul.f32 %v3075_v34, %v2705_v58  ;;  %v1207_v41 = vmax.f32 %v1191_v39, 0.0  ;;  %v1190_v58 = vadd.f32 %v1174_v57, %v2731_v13 }
 0x198   : > { %v1618_v0 = vld [vmem:[#allocation2 + $0xa8] sm:$0xff]  ;;  %v1159_v24 = vpop.f32.mrf.mxu0  ;;  %v3567_v57 = vmax.f32 %v2882_v26, 0.0 }
 0x199   : > { %v1634_v47 = vsel %vm3028_vm6, -inf, %v1618_v0  ;;  %1675 = vst.msk [vmem:[#allocation2 + $0xa8] sm:$0xff] %vm1490_vm3, %v3560_v18 }
 0x19a   : > { %v3167_v27 = vmax.f32 %v1634_v47, %v736_v5  ;;  %v3196_v34 = vpop.f32.mrf.mxu0 }
 0x19c   : > { %v1693_v43 = vpop.permute.xlu0 %1692 }
 0x19d   : > { %1756 = vst.msk [vmem:[#allocation2] sm:$0xff] %vm1579_vm4, %v1693_v43 }
 0x19e   : > { %v1695_v21 = vpop.permute.xlu1 %1694 }
 0x19f   : > { %v1724_v46 = vsel %vm1490_vm3, %v1693_v43, %v1695_v21  ;;  %v1193_v43 = vadd.f32 %v1177_v38, %v2748_v20 }
 0x1a0   : > { %v1797_v5 = vsel %vm3012_vm5, -inf, %v1724_v46  ;;  %v1697_v0 = vpop.permute.xlu0 %1696  ;;  %v1204_v46 = vmax.f32 %v1188_v19, 0.0  ;;  %v1192_v19 = vadd.f32 %v1176_v30, %v2748_v20  ;;  %v1178_v20 = vmul.f32 %v3115_v9, %v2709_v60  ;;  %v1165_v30 = vpop.f32.mrf.mxu0 }
 0x1a1   : > { %v1813_v47 = vmax.f32 %v1797_v5, %v1205_v52  ;;  %1759 = vst.msk [vmem:[#allocation2 + $0x18] sm:$0xff] %vm1579_vm4, %v1697_v0  ;;  %v1209_v13 = vmax.f32 %v1193_v43, 0.0  ;;  %v1183_v9 = vmul.f32 %v1159_v24, %v2713_v62  ;;  %v3570_v24 = vmax.f32 %v2879_v17, 0.0 }
 0x1a2   : > { %v1699_v14 = vpop.permute.xlu1 %1698  ;;  %v1208_v60 = vmax.f32 %v1192_v19, 0.0 }
 0x1a3   : > { %v1725_v4 = vsel %vm1490_vm3, %v1697_v0, %v1699_v14  ;;  %v3190_v21 = vmax.f32 %v1813_v47, %v3566_v51  ;;  %v1195_v47 = vadd.f32 %v1179_v59, %v2764_v29  ;;  %v1181_v14 = vmul.f32 %v1155_v8, %v2711_v61 }
 0x1a4   : > { %v1780_v49 = vld [vmem:[#allocation2] sm:$0xff]  ;;  %v1799_v52 = vsel %vm3012_vm5, -inf, %v1725_v4  ;;  %v1701_v39 = vpop.permute.xlu0 %1700  ;;  %v3568_v4 = vmax.f32 %v2865_v45, 0.0  ;;  %v1199_v17 = vadd.f32 %v1183_v9, %v2799_v48  ;;  %v3572_v9 = vmax.f32 %v2891_v50, 0.0 }
 0x1a5   : > { %v1796_v38 = vsel %vm3028_vm6, -inf, %v1780_v49  ;;  %1871 = vrot.lane.b32.xlu1 %v3190_v21, %s2387_s27  ;;  %v1815_v53 = vmax.f32 %v1799_v52, %v1207_v41  ;;  %1845 = vst.msk [vmem:[#allocation2] sm:$0xff] %vm1844_vm7, %v3560_v18  ;;  %v1206_v49 = vmax.f32 %v1190_v58, 0.0  ;;  %v1211_v58 = vmax.f32 %v1195_v47, 0.0 }
 0x1a6   : > { %1762 = vst.msk [vmem:[#allocation2 + $0x30] sm:$0xff] %vm1579_vm4, %v1701_v39  ;;  %v1812_v37 = vmax.f32 %v1796_v38, %v1204_v46  ;;  %v1703_v5 = vpop.permute.xlu1 %1702  ;;  %v1215_v50 = vmax.f32 %v1199_v17, 0.0 }
 0x1a7   : > { %v3208_v0 = vmax.f32 %v1815_v53, %v3567_v57  ;;  %v1726_v41 = vsel %vm1490_vm3, %v1701_v39, %v1703_v5  ;;  %v1197_v39 = vadd.f32 %v1181_v14, %v2785_v40  ;;  %v3569_v53 = vmax.f32 %v2903_v33, 0.0  ;;  %v1167_v57 = vpop.f32.mrf.mxu0 }
 0x1a8   : > { %v3215_v51 = vmax.f32 %v1812_v37, %v3568_v4  ;;  %v1705_v43 = vpop.permute.xlu0 %1704  ;;  %v1782_v46 = vld [vmem:[#allocation2 + $0x18] sm:$0xff]  ;;  %v1801_v26 = vsel %vm3012_vm5, -inf, %v1726_v41  ;;  %v1194_v5 = vadd.f32 %v1178_v20, %v2764_v29  ;;  %v1185_v20 = vmul.f32 %v1165_v30, %v2715_v63 }
 0x1a9   : > { %1875 = vrot.lane.b32.xlu1 %v3208_v0, %s2387_s27  ;;  %1765 = vst.msk [vmem:[#allocation2 + $0x48] sm:$0xff] %vm1579_vm4, %v1705_v43  ;;  %v1798_v45 = vsel %vm3028_vm6, -inf, %v1782_v46  ;;  %v1817_v8 = vmax.f32 %v1801_v26, %v1209_v13  ;;  %v1180_v13 = vmul.f32 %v3146_v1, %v2711_v61  ;;  %v1182_v61 = vmul.f32 %v3171_v35, %v2713_v62  ;;  %v1169_v62 = vpop.f32.mrf.mxu0 }
 0x1aa   : > { %1869 = vrot.lane.b32.xlu0 %v3215_v51, %s2387_s27  ;;  %1846 = vst.msk [vmem:[#allocation2 + $0x18] sm:$0xff] %vm1844_vm7, %v3560_v18  ;;  %v1707_v59 = vpop.permute.xlu1 %1706  ;;  %v1814_v52 = vmax.f32 %v1798_v45, %v1206_v49  ;;  %v1213_v49 = vmax.f32 %v1197_v39, 0.0  ;;  %v3571_v46 = vmax.f32 %v2915_v25, 0.0  ;;  %v1210_v45 = vmax.f32 %v1194_v5, 0.0 }
 0x1ab   : > { %v1727_v38 = vsel %vm1490_vm3, %v1705_v43, %v1707_v59  ;;  %v3235_v37 = vmax.f32 %v1817_v8, %v3569_v53  ;;  %v1196_v8 = vadd.f32 %v1180_v13, %v2785_v40  ;;  %v1198_v40 = vadd.f32 %v1182_v61, %v2799_v48 }
 0x1ac   : > { %v1709_v19 = vpop.permute.xlu0 %1708  ;;  %v3242_v41 = vmax.f32 %v1814_v52, %v3570_v24  ;;  %v1803_v14 = vsel %vm3012_vm5, -inf, %v1727_v38  ;;  %v1201_v38 = vadd.f32 %v1185_v20, %v2815_v55  ;;  %v1187_v53 = vmul.f32 %v1169_v62, %v2717_v2 }
 0x1ad   : > { %v1784_v47 = vld [vmem:[#allocation2 + $0x30] sm:$0xff]  ;;  %1768 = vst.msk [vmem:[#allocation2 + $0x60] sm:$0xff] %vm1579_vm4, %v1709_v19  ;;  %1879 = vrot.lane.b32.xlu1 %v3235_v37, %s2387_s27  ;;  %v1819_v29 = vmax.f32 %v1803_v14, %v1211_v58  ;;  %v3573_v13 = vmax.f32 %v2930_v3, 0.0  ;;  %v1212_v24 = vmax.f32 %v1196_v8, 0.0  ;;  %v1184_v48 = vmul.f32 %v3196_v34, %v2715_v63 }
 0x1ae   : > { %v1800_v33 = vsel %vm3028_vm6, -inf, %v1784_v47  ;;  %1847 = vst.msk [vmem:[#allocation2 + $0x30] sm:$0xff] %vm1844_vm7, %v3560_v18  ;;  %v1711_v1 = vpop.permute.xlu1 %1710  ;;  %1873 = vrot.lane.b32.xlu0 %v3242_v41, %s2387_s27  ;;  %v3574_v14 = vmax.f32 %v2906_v12, 0.0  ;;  %v1214_v63 = vmax.f32 %v1198_v40, 0.0  ;;  %v3575_v20 = vmax.f32 %v2948_v23, 0.0 }
 0x1af   : > { %v1816_v4 = vmax.f32 %v1800_v33, %v1208_v60  ;;  %v1728_v43 = vsel %vm1490_vm3, %v1709_v19, %v1711_v1  ;;  %v3262_v26 = vmax.f32 %v1819_v29, %v3571_v46  ;;  %v1217_v1 = vmax.f32 %v1201_v38, 0.0 }
 0x1b0   : > { %v1713_v35 = vpop.permute.xlu0 %1712  ;;  %v1786_v52 = vld [vmem:[#allocation2 + $0x48] sm:$0xff]  ;;  %v1805_v60 = vsel %vm3012_vm5, -inf, %v1728_v43  ;;  %v1200_v46 = vadd.f32 %v1184_v48, %v2815_v55  ;;  %v3576_v62 = vmax.f32 %v2924_v36, 0.0  ;;  %v3581_v48 = vld [vmem:[#allocation19_spill] sm:$0xff] }
 0x1b1   : > { %v3267_v59 = vmax.f32 %v1816_v4, %v3572_v9  ;;  %1771 = vst.msk [vmem:[#allocation2 + $0x78] sm:$0xff] %vm1579_vm4, %v1713_v35  ;;  %v1802_v25 = vsel %vm3028_vm6, -inf, %v1786_v52  ;;  %1883 = vrot.lane.b32.xlu1 %v3262_v26, %s2387_s27  ;;  %v1821_v30 = vmax.f32 %v1805_v60, %v1213_v49  ;;  %v1203_v4 = vadd.f32 %v1187_v53, %v2839_v22 }
 0x1b2   : > { %1848 = vst.msk [vmem:[#allocation2 + $0x48] sm:$0xff] %vm1844_vm7, %v3560_v18  ;;  %v1715_v58 = vpop.permute.xlu1 %1714  ;;  %v1818_v39 = vmax.f32 %v1802_v25, %v1210_v45  ;;  %v1186_v45 = vmul.f32 %v1167_v57, %v2717_v2  ;;  %v3577_v25 = vmax.f32 %v2963_v11, 0.0  ;;  %v1216_v40 = vmax.f32 %v1200_v46, 0.0 }
 0x1b3   : > { %1877 = vrot.lane.b32.xlu0 %v3267_v59, %s2387_s27  ;;  %v1729_v5 = vsel %vm1490_vm3, %v1713_v35, %v1715_v58  ;;  %v3286_v19 = vmax.f32 %v1821_v30, %v3573_v13  ;;  %v1219_v57 = vmax.f32 %v1203_v4, 0.0  ;;  %v3578_v58 = vmax.f32 %v2939_v42, 0.0 }
 0x1b4   : > { %v1717_v47 = vpop.permute.xlu0 %1716  ;;  %v3292_v33 = vmax.f32 %v1818_v39, %v3574_v14  ;;  %v1788_v29 = vld [vmem:[#allocation2 + $0x60] sm:$0xff]  ;;  %v1807_v61 = vsel %vm3012_vm5, -inf, %v1729_v5 }
 0x1b5   : > { %1774 = vst.msk [vmem:[#allocation2 + $0x90] sm:$0xff] %vm1579_vm4, %v1717_v47  ;;  %v1804_v3 = vsel %vm3028_vm6, -inf, %v1788_v29  ;;  %1887 = vrot.lane.b32.xlu1 %v3286_v19, %s2387_s27  ;;  %v1823_v17 = vmax.f32 %v1807_v61, %v1215_v50  ;;  %v1202_v50 = vadd.f32 %v1186_v45, %v2839_v22  ;;  %v3579_v22 = vld [vmem:[#allocation21_spill] sm:$0xff] }
 0x1b6   : > { %1849 = vst.msk [vmem:[#allocation2 + $0x60] sm:$0xff] %vm1844_vm7, %v3560_v18  ;;  %v1719_v12 = vpop.permute.xlu1 %1718  ;;  %v1820_v34 = vmax.f32 %v1804_v3, %v1212_v24  ;;  %v3580_v13 = vmax.f32 %v3579_v22, 0.0 }
 0x1b7   : > { %1881 = vrot.lane.b32.xlu0 %v3292_v33, %s2387_s27  ;;  %v1730_v49 = vsel %vm1490_vm3, %v1717_v47, %v1719_v12  ;;  %v3309_v43 = vmax.f32 %v1823_v17, %v3575_v20  ;;  %v1218_v7 = vmax.f32 %v1202_v50, 0.0  ;;  %v3582_v47 = vmax.f32 %v3581_v48, 0.0  ;;  %v3583_v17 = vld [vmem:[#allocation20_spill] sm:$0xff] }
 0x1b8   : > { %v1721_v8 = vpop.permute.xlu0 %1720  ;;  %v3315_v35 = vmax.f32 %v1820_v34, %v3576_v62  ;;  %v1790_v9 = vld [vmem:[#allocation2 + $0x78] sm:$0xff]  ;;  %v1809_v52 = vsel %vm3012_vm5, -inf, %v1730_v49 }
 0x1b9   : > { %1777 = vst.msk [vmem:[#allocation2 + $0xa8] sm:$0xff] %vm1579_vm4, %v1721_v8  ;;  %v1806_v23 = vsel %vm3028_vm6, -inf, %v1790_v9  ;;  %1891 = vrot.lane.b32.xlu1 %v3309_v43, %s2387_s27  ;;  %v1825_v55 = vmax.f32 %v1809_v52, %v1217_v1  ;;  %v3585_v1 = vld [vmem:[#allocation4_spill] sm:$0xff]  ;;  %v3587_v49 = vld [vmem:[#allocation22_spill] sm:$0xff] }
 0x1ba   : > { %1850 = vst.msk [vmem:[#allocation2 + $0x78] sm:$0xff] %vm1844_vm7, %v3560_v18  ;;  %v1723_v2 = vpop.permute.xlu1 %1722  ;;  %v1822_v36 = vmax.f32 %v1806_v23, %v1214_v63  ;;  %v3584_v63 = vmax.f32 %v3583_v17, 0.0  ;;  %v3586_v4 = vmax.f32 %v3585_v1, 0.0  ;;  %v3588_v9 = vld [vmem:[#allocation6_spill] sm:$0xff] }
 0x1bb   : > { %1885 = vrot.lane.b32.xlu0 %v3315_v35, %s2387_s27  ;;  %v1731_v60 = vsel %vm1490_vm3, %v1721_v8, %v1723_v2  ;;  %v3331_v30 = vmax.f32 %v1825_v55, %v3577_v25  ;;  %v3589_v52 = vmax.f32 %v3588_v9, 0.0 }
 0x1bc   : > { %v3336_v39 = vmax.f32 %v1822_v36, %v3578_v58  ;;  %v1792_v38 = vld [vmem:[#allocation2 + $0x90] sm:$0xff]  ;;  %v1811_v53 = vsel %vm3012_vm5, -inf, %v1731_v60  ;;  %v1653_v20 = vmax.f32 %v3587_v49, %v3586_v4  ;;  %v3590_v36 = vld [vmem:[#allocation3_spill] sm:$0xff]  ;;  %v3593_v58 = vld [vmem:[#allocation8_spill] sm:$0xff] }
 0x1bd   : > { %v1808_v5 = vsel %vm3028_vm6, -inf, %v1792_v38  ;;  %1895 = vrot.lane.b32.xlu1 %v3331_v30, %s2387_s27  ;;  %v1827_v11 = vmax.f32 %v1811_v53, %v1219_v57  ;;  %1851 = vst.msk [vmem:[#allocation2 + $0x90] sm:$0xff] %vm1844_vm7, %v3560_v18  ;;  %v1655_v23 = vmax.f32 %v3045_v16, %v3589_v52  ;;  %v3591_v57 = vmax.f32 %v3590_v36, 0.0  ;;  %v3592_v60 = vld [vmem:[#allocation23_spill] sm:$0xff] }
 0x1be   : > { %v1824_v42 = vmax.f32 %v1808_v5, %v1216_v40  ;;  %v3594_v38 = vmax.f32 %v3593_v58, 0.0  ;;  %v3600_v4 = vld [vmem:[#allocation7_spill] sm:$0xff] }
 0x1bf   : > { %1889 = vrot.lane.b32.xlu0 %v3336_v39, %s2387_s27  ;;  %v3350_v24 = vmax.f32 %v1827_v11, %v3580_v13  ;;  %v1652_v25 = vmax.f32 %v3592_v60, %v3591_v57  ;;  %v3601_v49 = vmax.f32 %v3600_v4, 0.0  ;;  %v3608_v60 = vld [vmem:[#allocation27_spill] sm:$0xff] }
 0x1c0   : > { %v3354_v14 = vmax.f32 %v1824_v42, %v3582_v47  ;;  %v1794_v29 = vld [vmem:[#allocation2 + $0xa8] sm:$0xff]  ;;  %v1657_v53 = vmax.f32 %v3064_v10, %v3594_v38 }
 0x1c1   : > { %v1810_v61 = vsel %vm3028_vm6, -inf, %v1794_v29  ;;  %1899 = vrot.lane.b32.xlu1 %v3350_v24, %s2387_s27  ;;  %1852 = vst.msk [vmem:[#allocation2 + $0xa8] sm:$0xff] %vm1844_vm7, %v3560_v18  ;;  %v3597_v47 = vld [vmem:[#allocation24_spill] sm:$0xff] }
 0x1c2   : > { %v1826_v3 = vmax.f32 %v1810_v61, %v1218_v7  ;;  %v3595_v7 = vld [vmem:[#allocation5_spill] sm:$0xff] }
 0x1c3   : > { %1893 = vrot.lane.b32.xlu0 %v3354_v14, %s2387_s27  ;;  %v3596_v48 = vmax.f32 %v3595_v7, 0.0 }
 0x1c4   : > { %v3366_v12 = vmax.f32 %v1826_v3, %v3584_v63  ;;  %v3598_v3 = vld [vmem:[#allocation10_spill] sm:$0xff] }
 0x1c5   : > { %v1654_v29 = vmax.f32 %v3597_v47, %v3596_v48  ;;  %v3599_v10 = vmax.f32 %v3598_v3, 0.0  ;;  %v3613_v48 = vld [vmem:[#allocation16_spill] sm:$0xff] }
 0x1c6   : > { %v3614_v47 = vmax.f32 %v3613_v48, 0.0 }
 0x1c7   : > { %1897 = vrot.lane.b32.xlu0 %v3366_v12, %s2387_s27  ;;  %v1659_v17 = vmax.f32 %v3084_v6, %v3599_v10 }
 0x217   : > { %v1872_v34 = vpop.permute.xlu1 %1871 }
 0x21b   : > { %v1876_v44 = vpop.permute.xlu1 %1875 }
 0x21c   : > { %v1870_v18 = vpop.permute.xlu0 %1869 }
 0x21d   : > { %1934 = vst.msk [vmem:[#allocation2] sm:$0xff] %vm1933_vm8, %v1870_v18  ;;  %v1901_v46 = vsel %vm1844_vm7, %v1870_v18, %v1872_v34 }
 0x21e   : > { %v1975_v45 = vmax.f32 %v1901_v46, %v1653_v20  ;;  %v3602_v20 = vld [vmem:[#allocation25_spill] sm:$0xff] }
 0x21f   : > { %v1880_v62 = vpop.permute.xlu1 %1879  ;;  %v1656_v18 = vmax.f32 %v3602_v20, %v3601_v49 }
 0x220   : > { %v1991_v8 = vmax.f32 %v1975_v45, %v3190_v21  ;;  %v1874_v55 = vpop.permute.xlu0 %1873  ;;  %v3603_v45 = vld [vmem:[#allocation12_spill] sm:$0xff] }
 0x221   : > { %1937 = vst.msk [vmem:[#allocation2 + $0x18] sm:$0xff] %vm1933_vm8, %v1874_v55  ;;  %v1902_v2 = vsel %vm1844_vm7, %v1874_v55, %v1876_v44 }
 0x222   : > { %2007 = vst [vmem:[%s3379_s8 + $0x8] sm:$0xff] %v1991_v8  ;;  %v1977_v40 = vmax.f32 %v1902_v2, %v1655_v23  ;;  %v3604_v8 = vmax.f32 %v3603_v45, 0.0 }
 0x223   : > { %v1884_v21 = vpop.permute.xlu1 %1883 }
 0x224   : > { %v1958_v50 = vld [vmem:[#allocation2] sm:$0xff]  ;;  %v1993_v5 = vmax.f32 %v1977_v40, %v3208_v0 }
 0x225   : > { %v1974_v16 = vmax.f32 %v1958_v50, %v1652_v25  ;;  %v1878_v11 = vpop.permute.xlu0 %1877 }
 0x226   : > { %1940 = vst.msk [vmem:[#allocation2 + $0x30] sm:$0xff] %vm1933_vm8, %v1878_v11  ;;  %v1903_v42 = vsel %vm1844_vm7, %v1878_v11, %v1880_v62  ;;  %2009 = vst [vmem:[%s3379_s8 + $0x18] sm:$0xff] %v1993_v5  ;;  %v3605_v62 = vld [vmem:[#allocation26_spill] sm:$0xff] }
 0x227   : > { %v1990_v22 = vmax.f32 %v1974_v16, %v3215_v51  ;;  %v1979_v13 = vmax.f32 %v1903_v42, %v1657_v53  ;;  %v1888_v61 = vpop.permute.xlu1 %1887 }
 0x228   : > { %v1960_v0 = vld [vmem:[#allocation2 + $0x18] sm:$0xff] }
 0x229   : > { %2006 = vst [vmem:[%s3379_s8] sm:$0xff] %v1990_v22  ;;  %v1995_v63 = vmax.f32 %v1979_v13, %v3235_v37  ;;  %v1882_v34 = vpop.permute.xlu0 %1881  ;;  %v1976_v44 = vmax.f32 %v1960_v0, %v1654_v29  ;;  %v1661_v37 = vmax.f32 %v3605_v62, %v3604_v8  ;;  %v3621_v8 = vld [vmem:[#allocation17_spill] sm:$0xff] }
 0x22a   : > { %1943 = vst.msk [vmem:[#allocation2 + $0x48] sm:$0xff] %vm1933_vm8, %v1882_v34  ;;  %v1904_v51 = vsel %vm1844_vm7, %v1882_v34, %v1884_v21  ;;  %v3609_v21 = vld [vmem:[#allocation14_spill] sm:$0xff]  ;;  %v3622_v62 = vmax.f32 %v3621_v8, 0.0 }
 0x22b   : > { %2011 = vst [vmem:[%s3379_s8 + $0x28] sm:$0xff] %v1995_v63  ;;  %v1981_v1 = vmax.f32 %v1904_v51, %v1659_v17  ;;  %v1992_v6 = vmax.f32 %v1976_v44, %v3242_v41  ;;  %v1892_v46 = vpop.permute.xlu1 %1891  ;;  %v3606_v41 = vld [vmem:[#allocation9_spill] sm:$0xff]  ;;  %v3610_v58 = vmax.f32 %v3609_v21, 0.0  ;;  %v3617_v34 = vld [vmem:[#allocation18_spill] sm:$0xff] }
 0x22c   : > { %v3607_v57 = vmax.f32 %v3606_v41, 0.0  ;;  %v3618_v44 = vmax.f32 %v3617_v34, 0.0 }
 0x22d   : > { %v1962_v9 = vld [vmem:[#allocation2 + $0x30] sm:$0xff]  ;;  %v1997_v52 = vmax.f32 %v1981_v1, %v3262_v26  ;;  %v1886_v23 = vpop.permute.xlu0 %1885  ;;  %2008 = vst [vmem:[%s3379_s8 + $0x10] sm:$0xff] %v1992_v6  ;;  %v1663_v26 = vmax.f32 %v3124_v32, %v3610_v58 }
 0x22e   : > { %v1978_v55 = vmax.f32 %v1962_v9, %v1656_v18  ;;  %1946 = vst.msk [vmem:[#allocation2 + $0x60] sm:$0xff] %vm1933_vm8, %v1886_v23  ;;  %v1905_v2 = vsel %vm1844_vm7, %v1886_v23, %v1888_v61  ;;  %v1658_v25 = vmax.f32 %v3608_v60, %v3607_v57 }
 0x22f   : > { %2013 = vst [vmem:[%s3379_s8 + $0x38] sm:$0xff] %v1997_v52  ;;  %v1983_v36 = vmax.f32 %v1905_v2, %v1661_v37  ;;  %v1896_v50 = vpop.permute.xlu1 %1895  ;;  %v1666_v37 = vmax.f32 %v3167_v27, %v3622_v62 }
 0x230   : > { %v1994_v40 = vmax.f32 %v1978_v55, %v3267_v59  ;;  %v3611_v59 = vld [vmem:[#allocation11_spill] sm:$0xff] }
 0x231   : > { %v1964_v38 = vld [vmem:[#allocation2 + $0x48] sm:$0xff]  ;;  %v1999_v53 = vmax.f32 %v1983_v36, %v3286_v19  ;;  %v1890_v16 = vpop.permute.xlu0 %1889  ;;  %v3612_v22 = vmax.f32 %v3611_v59, 0.0  ;;  %v1665_v19 = vmax.f32 %v3140_v15, %v3614_v47 }
 0x232   : > { %2010 = vst [vmem:[%s3379_s8 + $0x20] sm:$0xff] %v1994_v40  ;;  %v1980_v5 = vmax.f32 %v1964_v38, %v1658_v25  ;;  %1949 = vst.msk [vmem:[#allocation2 + $0x78] sm:$0xff] %vm1933_vm8, %v1890_v16  ;;  %v1906_v11 = vsel %vm1844_vm7, %v1890_v16, %v1892_v46 }
 0x233   : > { %2015 = vst [vmem:[%s3379_s8 + $0x48] sm:$0xff] %v1999_v53  ;;  %v1985_v42 = vmax.f32 %v1906_v11, %v1663_v26  ;;  %v1660_v13 = vmax.f32 %v3126_v31, %v3612_v22  ;;  %v1900_v7 = vpop.permute.xlu1 %1899 }
 0x234   : > { %v1996_v32 = vmax.f32 %v1980_v5, %v3292_v33  ;;  %v3615_v33 = vld [vmem:[#allocation13_spill] sm:$0xff] }
 0x235   : > { %v1966_v29 = vld [vmem:[#allocation2 + $0x60] sm:$0xff]  ;;  %v2001_v61 = vmax.f32 %v1985_v42, %v3309_v43  ;;  %v1894_v3 = vpop.permute.xlu0 %1893  ;;  %v3616_v0 = vmax.f32 %v3615_v33, 0.0  ;;  %v1667_v43 = vmax.f32 %v3154_v56, %v3618_v44 }
 0x236   : > { %2012 = vst [vmem:[%s3379_s8 + $0x30] sm:$0xff] %v1996_v32  ;;  %v1982_v10 = vmax.f32 %v1966_v29, %v1660_v13  ;;  %1952 = vst.msk [vmem:[#allocation2 + $0x90] sm:$0xff] %vm1933_vm8, %v1894_v3  ;;  %v1907_v17 = vsel %vm1844_vm7, %v1894_v3, %v1896_v50 }
 0x237   : > { %2017 = vst [vmem:[%s3379_s8 + $0x58] sm:$0xff] %v2001_v61  ;;  %v1987_v31 = vmax.f32 %v1907_v17, %v1665_v19  ;;  %v1662_v63 = vmax.f32 %v3142_v54, %v3616_v0 }
 0x238   : > { %v1998_v15 = vmax.f32 %v1982_v10, %v3315_v35  ;;  %v3619_v35 = vld [vmem:[#allocation15_spill] sm:$0xff] }
 0x239   : > { %v1968_v51 = vld [vmem:[#allocation2 + $0x78] sm:$0xff]  ;;  %v2003_v1 = vmax.f32 %v1987_v31, %v3331_v30  ;;  %v1898_v4 = vpop.permute.xlu0 %1897  ;;  %v3620_v18 = vmax.f32 %v3619_v35, 0.0 }
 0x23a   : > { %2014 = vst [vmem:[%s3379_s8 + $0x40] sm:$0xff] %v1998_v15  ;;  %v1984_v49 = vmax.f32 %v1968_v51, %v1662_v63  ;;  %1955 = vst.msk [vmem:[#allocation2 + $0xa8] sm:$0xff] %vm1933_vm8, %v1898_v4  ;;  %v1908_v20 = vsel %vm1844_vm7, %v1898_v4, %v1900_v7 }
 0x23b   : > { %2019 = vst [vmem:[%s3379_s8 + $0x68] sm:$0xff] %v2003_v1  ;;  %v1989_v54 = vmax.f32 %v1908_v20, %v1667_v43  ;;  %v1664_v6 = vmax.f32 %v3158_v28, %v3620_v18 }
 0x23c   : > { %v2000_v56 = vmax.f32 %v1984_v49, %v3336_v39 }
 0x23d   : > { %v1970_v46 = vld [vmem:[#allocation2 + $0x90] sm:$0xff]  ;;  %v2005_v30 = vmax.f32 %v1989_v54, %v3350_v24 }
 0x23e   : > { %2016 = vst [vmem:[%s3379_s8 + $0x50] sm:$0xff] %v2000_v56  ;;  %v1986_v45 = vmax.f32 %v1970_v46, %v1664_v6 }
 0x23f   : > { %2021 = vst [vmem:[%s3379_s8 + $0x78] sm:$0xff] %v2005_v30 }
 0x240   : > { %v2002_v9 = vmax.f32 %v1986_v45, %v3354_v14 }
 0x241   : > { %v1972_v52 = vld [vmem:[#allocation2 + $0xa8] sm:$0xff] }
 0x242   : > { %2018 = vst [vmem:[%s3379_s8 + $0x60] sm:$0xff] %v2002_v9  ;;  %v1988_v23 = vmax.f32 %v1972_v52, %v1666_v37 }
 0x244   : > { %v2004_v55 = vmax.f32 %v1988_v23, %v3366_v12 }
 0x246   : > { %2020 = vst [vmem:[%s3379_s8 + $0x70] sm:$0xff] %v2004_v55 }
 0x247 PF: > { %s17_s24 = sadd.s32 1, %s2381_s24  }
 0x248   : > { %p14_p4 = scmp.ge.s32.totalorder %s17_s24, 4  }
 0x24a   :  { %16 = sbr.rel (!%p14_p4) target bundleno = 1 (0x1), region = 87 }

</bundles_post_ra>
